<compile_context>
chip_gen: v7x
topology: tpu7x:2x2x1
jax: 0.10.0
libtpu: 0.0.40
codegen_flags: <defaults>
</compile_context>

<pallas_src>
import functools

import jax
import jax.numpy as jnp
from jax import lax
from jax.experimental import pallas as pl
from jax.experimental.pallas import tpu as pltpu


# ---------------------------------------------------------------------------
# Optional single-buffering (pipeline_mode=pl.Buffered(1)) for constant blocks,
# probed once at runtime; falls back to default double-buffering if unsupported.
# ---------------------------------------------------------------------------

_BUFFERED1_OK = None


def _probe_buffered1():
    if not hasattr(pl, "Buffered"):
        return False
    try:
        def k(x_ref, o_ref):
            o_ref[...] = x_ref[...] + 1.0

        x = jnp.arange(16 * 128, dtype=jnp.float32).reshape(16, 128)
        out = pl.pallas_call(
            k,
            out_shape=jax.ShapeDtypeStruct((16, 128), jnp.float32),
            grid=(2,),
            in_specs=[pl.BlockSpec((8, 128), lambda i: (i, 0),
                                   pipeline_mode=pl.Buffered(1))],
            out_specs=pl.BlockSpec((8, 128), lambda i: (i, 0)),
        )(x)
        jax.block_until_ready(out)
        return bool(jnp.allclose(out, x + 1.0))
    except Exception:
        return False


def _single_buffer_supported():
    global _BUFFERED1_OK
    if _BUFFERED1_OK is None:
        _BUFFERED1_OK = _probe_buffered1()
    return _BUFFERED1_OK


def _const_spec(block_shape, index_map):
    """BlockSpec for operands whose block is constant (or per-direction constant)."""
    if _single_buffer_supported():
        return pl.BlockSpec(block_shape, index_map, pipeline_mode=pl.Buffered(1))
    return pl.BlockSpec(block_shape, index_map)


def _pick_chunk(n, cap):
    """Largest divisor of n that is <= cap."""
    return max(c for c in range(1, min(n, cap) + 1) if n % c == 0)


# ----------------------- fused BiGRU + tag-projection kernel -----------------

def bigru_tag_kernel(emb_ref, lens_ref, wih_ref, whh_ref, bih_ref, bhh_ref,
                     wtag_ref, out_ref, h_ref, gx_sc, out_sc,
                     *, H, Tc, Nc, mxu_dtype):
    d = pl.program_id(0)          # direction: 0 = forward, 1 = backward
    j = pl.program_id(1)          # time-chunk index within the direction

    @pl.when(j == 0)
    def _():
        h_ref[...] = jnp.zeros_like(h_ref)

    Tcb, B, E = emb_ref.shape     # (Tc, B, E)

    # Whole-chunk input projection: one MXU matmul per chunk (gx never hits HBM).
    x = emb_ref[...].reshape(Tc * B, E).astype(mxu_dtype)
    gx = jnp.dot(x, wih_ref[0], preferred_element_type=jnp.float32) + bih_ref[0]
    gx_sc[...] = gx.reshape(Tc, B, 3 * H)

    whh = whh_ref[0]              # (H, 3H)
    bhh = bhh_ref[0]              # (1, 3H)
    wtag = wtag_ref[0]            # (H, T)   this direction's half of hidden2tag
    lens = lens_ref[...]          # (B, 1)

    # Which time-block of the sequence this grid step covers.
    tb = d * (Nc - 1 - j) + (1 - d) * j
    t0 = tb * Tc

    def step(l, h):
        # forward walks the chunk 0..Tc-1, backward walks it Tc-1..0
        li = jnp.where(d == 0, l, Tc - 1 - l)
        t = t0 + li
        gxl = gx_sc[li]                                        # (B, 3H)
        gh = jnp.dot(h.astype(mxu_dtype), whh,
                     preferred_element_type=jnp.float32) + bhh  # (B, 3H)

        r = jax.nn.sigmoid(gxl[:, 0:H] + gh[:, 0:H])
        z = jax.nn.sigmoid(gxl[:, H:2 * H] + gh[:, H:2 * H])
        n = jnp.tanh(gxl[:, 2 * H:3 * H] + r * gh[:, 2 * H:3 * H])
        h_new = (1.0 - z) * n + z * h

        # packed-sequence semantics: positions t >= len_b output zeros and do not
        # update the state (bwd direction effectively starts at t = len_b - 1).
        mask = t < lens                                        # (B, 1)
        out_t = jnp.where(mask, h_new, 0.0)
        # Fused tag projection: emit this direction's partial logits (B, T).
        out_sc[li] = jnp.dot(out_t.astype(mxu_dtype), wtag,
                             preferred_element_type=jnp.float32)
        return jnp.where(mask, h_new, h)

    h_ref[...] = lax.fori_loop(0, Tc, step, h_ref[...], unroll=(Tc <= 16))
    out_ref[0] = out_sc[...]      # one dense store per chunk


def fused_bigru_tag(embeds, lens_col, w_ih, w_hh, b_ih, b_hh, w_tag2,
                    *, tc, mxu_dtype):
    """embeds: (S,B,E) -> per-direction partial tag logits (2,S,B,T) float32."""
    S, B, E = embeds.shape
    H = w_hh.shape[1]
    T = w_tag2.shape[2]
    assert S % tc == 0, "tc must divide S"
    Nc = S // tc
    kernel = functools.partial(bigru_tag_kernel, H=H, Tc=tc, Nc=Nc,
                               mxu_dtype=mxu_dtype)

    def tmap(d, j):               # forward reads chunk j, backward reads Nc-1-j
        return d * (Nc - 1 - j) + (1 - d) * j

    return pl.pallas_call(
        kernel,
        out_shape=jax.ShapeDtypeStruct((2, S, B, T), jnp.float32),
        grid=(2, Nc),
        in_specs=[
            pl.BlockSpec((tc, B, E), lambda d, j: (tmap(d, j), 0, 0)),  # embeds chunk
            _const_spec((B, 1), lambda d, j: (0, 0)),                   # seq_lens
            _const_spec((1, E, 3 * H), lambda d, j: (d, 0, 0)),         # W_ih[d]
            _const_spec((1, H, 3 * H), lambda d, j: (d, 0, 0)),         # W_hh[d]
            _const_spec((1, 1, 3 * H), lambda d, j: (d, 0, 0)),         # b_ih[d]
            _const_spec((1, 1, 3 * H), lambda d, j: (d, 0, 0)),         # b_hh[d]
            _const_spec((1, H, T), lambda d, j: (d, 0, 0)),             # W_tag half d
        ],
        out_specs=pl.BlockSpec((1, tc, B, T), lambda d, j: (d, tmap(d, j), 0, 0)),
        scratch_shapes=[
            pltpu.VMEM((B, H), jnp.float32),           # carried hidden state
            pltpu.VMEM((tc, B, 3 * H), jnp.float32),   # per-chunk gx
            pltpu.VMEM((tc, B, T), jnp.float32),       # per-chunk partial logits
        ],
        compiler_params=pltpu.CompilerParams(
            dimension_semantics=("parallel", "arbitrary")),
    )(embeds, lens_col, w_ih, w_hh, b_ih, b_hh, w_tag2)


# ----------------------------- CE loss kernel --------------------------------

def ce_loss_kernel(plog_ref, tags_ref, lens_ref, b_ref, out_ref, acc_ref,
                   *, Ts, T, Ns):
    p = pl.program_id(0)          # parallel shard (partial sum per shard)
    j = pl.program_id(1)          # time chunk within the shard

    @pl.when(j == 0)
    def _():
        acc_ref[...] = jnp.zeros_like(acc_ref)

    logits = plog_ref[0] + plog_ref[1] + b_ref[...]            # (Ts, B, T)
    _, B, _ = logits.shape

    m = jnp.max(logits, axis=2, keepdims=True)
    logz = m + jnp.log(jnp.sum(jnp.exp(logits - m), axis=2, keepdims=True))
    logp = logits - logz                                       # (Ts, B, T)

    tag = tags_ref[...]                                        # (Ts, B, 1)
    onehot = lax.broadcasted_iota(jnp.int32, (Ts, B, T), 2) == tag
    sel = jnp.sum(jnp.where(onehot, logp, 0.0), axis=2, keepdims=True)  # (Ts,B,1)

    t_idx = lax.broadcasted_iota(jnp.int32, (Ts, B, 1), 0) + (p * Ns + j) * Ts
    mask = t_idx < lens_ref[...]
    contrib = jnp.sum(jnp.where(mask, sel, 0.0).reshape(Ts * B, 1),
                      axis=0, keepdims=True)                   # (1, 1)
    acc_ref[...] += contrib

    @pl.when(j == pl.num_programs(1) - 1)
    def _():
        out_ref[0] = -acc_ref[...]


def ce_loss(plog, tags3d, lens3, b_tag, *, ts, shards=2):
    """plog: (2,S,B,T) partial logits -> scalar CE loss."""
    _, S, B, T = plog.shape
    P = shards if (S % shards == 0) else 1
    assert (S // P) % ts == 0, "ts must divide S // shards"
    Ns = (S // P) // ts
    kernel = functools.partial(ce_loss_kernel, Ts=ts, T=T, Ns=Ns)
    out = pl.pallas_call(
        kernel,
        out_shape=jax.ShapeDtypeStruct((P, 1, 1), jnp.float32),
        grid=(P, Ns),
        in_specs=[
            pl.BlockSpec((2, ts, B, T), lambda p, j: (0, p * Ns + j, 0, 0)),
            pl.BlockSpec((ts, B, 1), lambda p, j: (p * Ns + j, 0, 0)),
            _const_spec((1, B, 1), lambda p, j: (0, 0, 0)),
            _const_spec((1, T), lambda p, j: (0, 0)),
        ],
        out_specs=pl.BlockSpec((1, 1, 1), lambda p, j: (p, 0, 0)),
        scratch_shapes=[pltpu.VMEM((1, 1), jnp.float32)],
        compiler_params=pltpu.CompilerParams(
            dimension_semantics=("parallel", "arbitrary")),
    )(plog, tags3d, lens3, b_tag)
    return jnp.sum(out)


# ----------------------------- model wrapper ---------------------------------

def sequence_labeling_forward(params, words, tags, seq_lens, *,
                              tc=None, ts=None, loss_shards=2,
                              mxu_dtype=jnp.float32):
    """words/tags: (S, B) int32, seq_lens: (B,) int32 -> scalar loss."""
    S, B = words.shape
    H = params["w_hh"].shape[1]

    if tc is None:
        tc = _pick_chunk(S, 32)
    if ts is None:
        base = S // loss_shards if S % loss_shards == 0 else S
        ts = _pick_chunk(base, 64)

    embeds = params["emb"][words].astype(mxu_dtype)     # (S, B, E), plain-JAX gather
    # dropout_before_rnn / dropout_after_rnn with p = 0.0 -> identity

    lens_col = seq_lens.reshape(B, 1).astype(jnp.int32)
    # hidden2tag split into fwd/bwd halves (avoids any feature concat round-trip).
    w_tag2 = jnp.stack([params["w_tag"][:H], params["w_tag"][H:]]).astype(mxu_dtype)

    plog = fused_bigru_tag(embeds, lens_col,
                           params["w_ih"].astype(mxu_dtype),
                           params["w_hh"].astype(mxu_dtype),
                           params["b_ih"], params["b_hh"],
                           w_tag2, tc=tc, mxu_dtype=mxu_dtype)   # (2,S,B,T) f32

    tags3d = tags.reshape(S, B, 1).astype(jnp.int32)
    lens3 = seq_lens.reshape(1, B, 1).astype(jnp.int32)
    return ce_loss(plog, tags3d, lens3, params["b_tag"], ts=ts, shards=loss_shards)


# ----------------------------- pure-JAX reference ----------------------------

def reference_forward(params, words, tags, seq_lens):
    S, B = words.shape
    H = params["w_hh"].shape[1]
    emb = params["emb"][words]
    lens = seq_lens.reshape(B, 1)

    def cell(x, h, d):
        gx = x @ params["w_ih"][d] + params["b_ih"][d]
        gh = h @ params["w_hh"][d] + params["b_hh"][d]
        r = jax.nn.sigmoid(gx[:, :H] + gh[:, :H])
        z = jax.nn.sigmoid(gx[:, H:2 * H] + gh[:, H:2 * H])
        n = jnp.tanh(gx[:, 2 * H:] + r * gh[:, 2 * H:])
        return (1.0 - z) * n + z * h

    hf = jnp.zeros((B, H), jnp.float32)
    out_f = []
    for t in range(S):
        hn = cell(emb[t], hf, 0)
        m = t < lens
        hf = jnp.where(m, hn, hf)
        out_f.append(jnp.where(m, hn, 0.0))
    hb = jnp.zeros((B, H), jnp.float32)
    out_b = [None] * S
    for t in range(S - 1, -1, -1):
        hn = cell(emb[t], hb, 1)
        m = t < lens
        hb = jnp.where(m, hn, hb)
        out_b[t] = jnp.where(m, hn, 0.0)
    feats = jnp.concatenate([jnp.stack(out_f), jnp.stack(out_b)], axis=-1)

    logits = feats @ params["w_tag"] + params["b_tag"]          # (S, B, T)
    logp = jax.nn.log_softmax(logits, axis=2)
    sel = jnp.take_along_axis(logp, tags[..., None], axis=2)[..., 0]   # (S, B)
    csum = jnp.cumsum(sel, axis=0)
    gathered = csum[seq_lens - 1, jnp.arange(B)]
    return -jnp.sum(gathered)


# ----------------------------- main ------------------------------------------

if __name__ == "__main__":
    S, B = 8, 8          # seq_len, batch_size
    V, E = 32, 16        # vocab size, word_emb_dim
    H = 16               # rnn_dim (per direction)
    T = 8                # number of tags

    key = jax.random.PRNGKey(0)
    ks = jax.random.split(key, 10)

    def u(k, shape):
        return jax.random.uniform(k, shape, jnp.float32, -0.1, 0.1)

    params = {
        "emb":   u(ks[0], (V, E)),
        "w_ih":  u(ks[1], (2, E, 3 * H)),
        "w_hh":  u(ks[2], (2, H, 3 * H)),
        "b_ih":  u(ks[3], (2, 1, 3 * H)),
        "b_hh":  u(ks[4], (2, 1, 3 * H)),
        "w_tag": u(ks[5], (2 * H, T)),
        "b_tag": u(ks[6], (1, T)),
    }

    words = jax.random.randint(ks[7], (S, B), 0, V, dtype=jnp.int32)
    tags = jax.random.randint(ks[8], (S, B), 0, T, dtype=jnp.int32)
    seq_lens = jax.random.randint(ks[9], (B,), 1, S + 1, dtype=jnp.int32)

    _single_buffer_supported()   # run the Buffered(1) capability probe up front

    def run_forward(**kw):
        return jax.block_until_ready(
            sequence_labeling_forward(params, words, tags, seq_lens,
                                      tc=4, ts=2, loss_shards=2, **kw))

    try:
        loss = run_forward()
    except Exception:
        # Disable the optional single-buffering optimization and retry.
        globals()["_BUFFERED1_OK"] = False
        loss = run_forward()

    ref = jax.block_until_ready(
        reference_forward(params, words, tags, seq_lens))

    assert jnp.isfinite(loss), "loss is not finite"
    assert jnp.allclose(loss, ref, rtol=1e-3, atol=1e-2), (loss, ref)

    # bf16 MXU-operand path (production setting on v6e/v7x): f32 accumulation and
    # gate math, bf16 matmul inputs; checked with a loose tolerance.
    loss_bf16 = run_forward(mxu_dtype=jnp.bfloat16)
    assert jnp.isfinite(loss_bf16), "bf16 loss is not finite"
    assert jnp.allclose(loss_bf16, ref, rtol=2e-2, atol=0.5), (loss_bf16, ref)

    # TODO(synk): char-RNN branch (char_rnn_dim=0 here) and CRF 'small'/'large'
    # loss variants are not exercised in this config; only the CELoss path is
    # implemented.
    print("KERNEL_OK")
</pallas_src>

<mosaic_0001>
module attributes {stable_mosaic.version = 11 : i64} {
  func.func @k(%arg0: i32, %arg1: memref<8x128xf32, #tpu.memory_space<vmem>>, %arg2: memref<8x128xf32, #tpu.memory_space<vmem>>) attributes {dimension_semantics = [#tpu.dimension_semantics<arbitrary>], iteration_bounds = array<i64: 2>, scalar_prefetch = 0 : i64, scratch_operands = 0 : i64, tpu.core_type = #tpu.core_type<tc>, window_params = [{pipeline_mode = #tpu.pipeline_mode<synchronous>, transform_indices = @transform_0, window_bounds = array<i64: 8, 128>}, {transform_indices = @transform_1, window_bounds = array<i64: 8, 128>}]} {
    %c0 = arith.constant 0 : index
    %c0_0 = arith.constant 0 : index
    %0 = vector.load %arg1[%c0, %c0_0] : memref<8x128xf32, #tpu.memory_space<vmem>>, vector<8x128xf32>
    %cst = arith.constant 1.000000e+00 : f32
    %1 = vector.broadcast %cst : f32 to vector<8x128xf32>
    %2 = arith.addf %0, %1 : vector<8x128xf32>
    %c0_1 = arith.constant 0 : index
    %c0_2 = arith.constant 0 : index
    %3 = vector.load %arg2[%c0_1, %c0_2] : memref<8x128xf32, #tpu.memory_space<vmem>>, vector<8x128xf32>
    tpu.vector_store %arg2[%c0_1, %c0_2], %2 {strides = array<i32>} : memref<8x128xf32, #tpu.memory_space<vmem>>, vector<8x128xf32>,
    return
  }
  func.func @transform_0(%arg0: i32) -> (i32, i32) {
    %c0_i32 = arith.constant 0 : i32
    %c0_i32_0 = arith.constant 0 : i32
    return %arg0, %c0_i32 : i32, i32
  }
  func.func @transform_1(%arg0: i32) -> (i32, i32) {
    %c0_i32 = arith.constant 0 : i32
    %c0_i32_0 = arith.constant 0 : i32
    return %arg0, %c0_i32 : i32, i32
  }
}

module attributes {stable_mosaic.version = 11 : i64} {
  func.func @bigru_tag_kernel(%arg0: i32, %arg1: i32, %arg2: memref<4x8x16xf32, #tpu.memory_space<vmem>>, %arg3: memref<8x1xi32, #tpu.memory_space<vmem>>, %arg4: memref<1x16x48xf32, #tpu.memory_space<vmem>>, %arg5: memref<1x16x48xf32, #tpu.memory_space<vmem>>, %arg6: memref<1x1x48xf32, #tpu.memory_space<vmem>>, %arg7: memref<1x1x48xf32, #tpu.memory_space<vmem>>, %arg8: memref<1x16x8xf32, #tpu.memory_space<vmem>>, %arg9: memref<1x4x8x8xf32, #tpu.memory_space<vmem>>, %arg10: memref<8x16xf32, #tpu.memory_space<vmem>>, %arg11: memref<4x8x48xf32, #tpu.memory_space<vmem>>, %arg12: memref<4x8x8xf32, #tpu.memory_space<vmem>>) attributes {dimension_semantics = [#tpu.dimension_semantics<parallel>, #tpu.dimension_semantics<arbitrary>], iteration_bounds = array<i64: 2, 2>, scalar_prefetch = 0 : i64, scratch_operands = 3 : i64, tpu.core_type = #tpu.core_type<tc>, window_params = [{transform_indices = @transform_0, window_bounds = array<i64: 4, 8, 16>}, {pipeline_mode = #tpu.pipeline_mode<synchronous>, transform_indices = @transform_1, window_bounds = array<i64: 8, 1>}, {transform_indices = @transform_2, window_bounds = array<i64: 1, 16, 48>}, {transform_indices = @transform_3, window_bounds = array<i64: 1, 16, 48>}, {transform_indices = @transform_4, window_bounds = array<i64: 1, 1, 48>}, {transform_indices = @transform_5, window_bounds = array<i64: 1, 1, 48>}, {transform_indices = @transform_6, window_bounds = array<i64: 1, 16, 8>}, {transform_indices = @transform_7, window_bounds = array<i64: 1, 4, 8, 8>}]} {
    %c0_i32 = arith.constant 0 : i32
    %0 = arith.cmpi eq, %arg1, %c0_i32 : i32
    %1 = arith.extui %0 : i1 to i32
    %c0_i32_0 = arith.constant 0 : i32
    %2 = arith.cmpi ne, %1, %c0_i32_0 : i32
    scf.if %2 {
      %cst_86 = arith.constant 0.000000e+00 : f32
      %233 = vector.broadcast %cst_86 : f32 to vector<8x16xf32>
      %c0_87 = arith.constant 0 : index
      %c0_88 = arith.constant 0 : index
      %234 = vector.load %arg10[%c0_87, %c0_88] : memref<8x16xf32, #tpu.memory_space<vmem>>, vector<8x16xf32>
      tpu.vector_store %arg10[%c0_87, %c0_88], %233 {strides = array<i32>} : memref<8x16xf32, #tpu.memory_space<vmem>>, vector<8x16xf32>,
    } else {
    }
    %c0 = arith.constant 0 : index
    %c0_1 = arith.constant 0 : index
    %c0_2 = arith.constant 0 : index
    %3 = vector.load %arg2[%c0, %c0_1, %c0_2] : memref<4x8x16xf32, #tpu.memory_space<vmem>>, vector<4x8x16xf32>
    %4 = vector.shape_cast %3 : vector<4x8x16xf32> to vector<32x16xf32>
    %c0_3 = arith.constant 0 : index
    %c0_4 = arith.constant 0 : index
    %c0_5 = arith.constant 0 : index
    %5 = vector.load %arg4[%c0_3, %c0_4, %c0_5] : memref<1x16x48xf32, #tpu.memory_space<vmem>>, vector<1x16x48xf32>
    %6 = vector.shape_cast %5 : vector<1x16x48xf32> to vector<16x48xf32>
    %cst = arith.constant dense<0.000000e+00> : vector<32x48xf32>
    %7 = tpu.matmul %4, %6, %cst {dimension_numbers = #tpu.dot_dimension_numbers<[1], [0], [0], [1], [0, 0, 1, 1], [], []>} : vector<32x16xf32>, vector<16x48xf32>, vector<32x48xf32> -> vector<32x48xf32>
    %c0_6 = arith.constant 0 : index
    %c0_7 = arith.constant 0 : index
    %c0_8 = arith.constant 0 : index
    %8 = vector.load %arg6[%c0_6, %c0_7, %c0_8] : memref<1x1x48xf32, #tpu.memory_space<vmem>>, vector<1x1x48xf32>
    %9 = vector.shape_cast %8 : vector<1x1x48xf32> to vector<1x48xf32>
    %10 = vector.broadcast %9 : vector<1x48xf32> to vector<32x48xf32>
    %11 = arith.addf %7, %10 : vector<32x48xf32>
    %12 = vector.shape_cast %11 : vector<32x48xf32> to vector<4x8x48xf32>
    %c0_9 = arith.constant 0 : index
    %c0_10 = arith.constant 0 : index
    %c0_11 = arith.constant 0 : index
    %13 = vector.load %arg11[%c0_9, %c0_10, %c0_11] : memref<4x8x48xf32, #tpu.memory_space<vmem>>, vector<4x8x48xf32>
    tpu.vector_store %arg11[%c0_9, %c0_10, %c0_11], %12 {strides = array<i32>} : memref<4x8x48xf32, #tpu.memory_space<vmem>>, vector<4x8x48xf32>,
    %c0_12 = arith.constant 0 : index
    %c0_13 = arith.constant 0 : index
    %c0_14 = arith.constant 0 : index
    %14 = vector.load %arg5[%c0_12, %c0_13, %c0_14] : memref<1x16x48xf32, #tpu.memory_space<vmem>>, vector<1x16x48xf32>
    %15 = vector.shape_cast %14 : vector<1x16x48xf32> to vector<16x48xf32>
    %c0_15 = arith.constant 0 : index
    %c0_16 = arith.constant 0 : index
    %c0_17 = arith.constant 0 : index
    %16 = vector.load %arg7[%c0_15, %c0_16, %c0_17] : memref<1x1x48xf32, #tpu.memory_space<vmem>>, vector<1x1x48xf32>
    %17 = vector.shape_cast %16 : vector<1x1x48xf32> to vector<1x48xf32>
    %c0_18 = arith.constant 0 : index
    %c0_19 = arith.constant 0 : index
    %c0_20 = arith.constant 0 : index
    %18 = vector.load %arg8[%c0_18, %c0_19, %c0_20] : memref<1x16x8xf32, #tpu.memory_space<vmem>>, vector<1x16x8xf32>
    %19 = vector.shape_cast %18 : vector<1x16x8xf32> to vector<16x8xf32>
    %c0_21 = arith.constant 0 : index
    %c0_22 = arith.constant 0 : index
    %20 = vector.load %arg3[%c0_21, %c0_22] : memref<8x1xi32, #tpu.memory_space<vmem>>, vector<8x1xi32>
    %c1_i32 = arith.constant 1 : i32
    %21 = arith.subi %c1_i32, %arg1 : i32
    %22 = arith.muli %arg0, %21 : i32
    %c1_i32_23 = arith.constant 1 : i32
    %23 = arith.subi %c1_i32_23, %arg0 : i32
    %24 = arith.muli %23, %arg1 : i32
    %25 = arith.addi %22, %24 : i32
    %c4_i32 = arith.constant 4 : i32
    %26 = arith.muli %25, %c4_i32 : i32
    %c0_24 = arith.constant 0 : index
    %c0_25 = arith.constant 0 : index
    %27 = vector.load %arg10[%c0_24, %c0_25] : memref<8x16xf32, #tpu.memory_space<vmem>>, vector<8x16xf32>
    %c0_i32_26 = arith.constant 0 : i32
    %c0_i32_27 = arith.constant 0 : i32
    %28 = arith.cmpi eq, %arg0, %c0_i32_27 : i32
    %c3_i32 = arith.constant 3 : i32
    %29 = arith.subi %c3_i32, %c0_i32_26 : i32
    %30 = arith.select %28, %c0_i32_26, %29 : i32
    %31 = arith.addi %26, %30 : i32
    %32 = arith.index_cast %30 : i32 to index
    %c0_28 = arith.constant 0 : index
    %c0_29 = arith.constant 0 : index
    %33 = vector.load %arg11[%32, %c0_28, %c0_29] : memref<4x8x48xf32, #tpu.memory_space<vmem>>, vector<1x8x48xf32>
    %34 = vector.shape_cast %33 : vector<1x8x48xf32> to vector<8x48xf32>
    %cst_30 = arith.constant dense<0.000000e+00> : vector<8x48xf32>
    %35 = tpu.matmul %27, %15, %cst_30 {dimension_numbers = #tpu.dot_dimension_numbers<[1], [0], [0], [1], [0, 0, 1, 1], [], []>} : vector<8x16xf32>, vector<16x48xf32>, vector<8x48xf32> -> vector<8x48xf32>
    %36 = vector.broadcast %17 : vector<1x48xf32> to vector<8x48xf32>
    %37 = arith.addf %35, %36 : vector<8x48xf32>
    %38 = vector.extract_strided_slice %34 {offsets = [0, 0], sizes = [8, 16], strides = [1, 1]} : vector<8x48xf32> to vector<8x16xf32>
    %39 = vector.extract_strided_slice %37 {offsets = [0, 0], sizes = [8, 16], strides = [1, 1]} : vector<8x48xf32> to vector<8x16xf32>
    %40 = arith.addf %38, %39 : vector<8x16xf32>
    %41 = arith.negf %40 : vector<8x16xf32>
    %42 = math.exp %41 : vector<8x16xf32>
    %cst_31 = arith.constant 1.000000e+00 : f32
    %43 = vector.broadcast %cst_31 : f32 to vector<8x16xf32>
    %44 = arith.addf %43, %42 : vector<8x16xf32>
    %45 = arith.divf %43, %44 : vector<8x16xf32>
    %46 = vector.extract_strided_slice %34 {offsets = [0, 16], sizes = [8, 16], strides = [1, 1]} : vector<8x48xf32> to vector<8x16xf32>
    %47 = vector.extract_strided_slice %37 {offsets = [0, 16], sizes = [8, 16], strides = [1, 1]} : vector<8x48xf32> to vector<8x16xf32>
    %48 = arith.addf %46, %47 : vector<8x16xf32>
    %49 = arith.negf %48 : vector<8x16xf32>
    %50 = math.exp %49 : vector<8x16xf32>
    %cst_32 = arith.constant 1.000000e+00 : f32
    %51 = vector.broadcast %cst_32 : f32 to vector<8x16xf32>
    %52 = arith.addf %51, %50 : vector<8x16xf32>
    %53 = arith.divf %51, %52 : vector<8x16xf32>
    %54 = vector.extract_strided_slice %34 {offsets = [0, 32], sizes = [8, 16], strides = [1, 1]} : vector<8x48xf32> to vector<8x16xf32>
    %55 = vector.extract_strided_slice %37 {offsets = [0, 32], sizes = [8, 16], strides = [1, 1]} : vector<8x48xf32> to vector<8x16xf32>
    %56 = arith.mulf %45, %55 : vector<8x16xf32>
    %57 = arith.addf %54, %56 : vector<8x16xf32>
    %58 = math.tanh %57 : vector<8x16xf32>
    %cst_33 = arith.constant 1.000000e+00 : f32
    %59 = vector.broadcast %cst_33 : f32 to vector<8x16xf32>
    %60 = arith.subf %59, %53 : vector<8x16xf32>
    %61 = arith.mulf %60, %58 : vector<8x16xf32>
    %62 = arith.mulf %53, %27 : vector<8x16xf32>
    %63 = arith.addf %61, %62 : vector<8x16xf32>
    %64 = vector.broadcast %31 : i32 to vector<8x1xi32>
    %65 = arith.cmpi slt, %64, %20 : vector<8x1xi32>
    %cst_34 = arith.constant 0.000000e+00 : f32
    %66 = vector.shape_cast %65 : vector<8x1xi1> to vector<8x1xi1>
    %67 = vector.broadcast %66 : vector<8x1xi1> to vector<8x16xi1>
    %68 = vector.broadcast %cst_34 : f32 to vector<8x16xf32>
    %69 = arith.select %67, %63, %68 : vector<8x16xi1>, vector<8x16xf32>
    %cst_35 = arith.constant dense<0.000000e+00> : vector<8x8xf32>
    %70 = tpu.matmul %69, %19, %cst_35 {dimension_numbers = #tpu.dot_dimension_numbers<[1], [0], [0], [1], [0, 0, 1, 1], [], []>} : vector<8x16xf32>, vector<16x8xf32>, vector<8x8xf32> -> vector<8x8xf32>
    %71 = arith.index_cast %30 : i32 to index
    %c0_36 = arith.constant 0 : index
    %c0_37 = arith.constant 0 : index
    %72 = vector.load %arg12[%71, %c0_36, %c0_37] : memref<4x8x8xf32, #tpu.memory_space<vmem>>, vector<1x8x8xf32>
    %73 = vector.shape_cast %72 : vector<1x8x8xf32> to vector<8x8xf32>
    %74 = vector.shape_cast %70 : vector<8x8xf32> to vector<1x8x8xf32>
    tpu.vector_store %arg12[%71, %c0_36, %c0_37], %74 {strides = array<i32>} : memref<4x8x8xf32, #tpu.memory_space<vmem>>, vector<1x8x8xf32>,
    %75 = vector.shape_cast %65 : vector<8x1xi1> to vector<8x1xi1>
    %76 = vector.broadcast %75 : vector<8x1xi1> to vector<8x16xi1>
    %77 = arith.select %76, %63, %27 : vector<8x16xi1>, vector<8x16xf32>
    %c1_i32_38 = arith.constant 1 : i32
    %c0_i32_39 = arith.constant 0 : i32
    %78 = arith.cmpi eq, %arg0, %c0_i32_39 : i32
    %c3_i32_40 = arith.constant 3 : i32
    %79 = arith.subi %c3_i32_40, %c1_i32_38 : i32
    %80 = arith.select %78, %c1_i32_38, %79 : i32
    %81 = arith.addi %26, %80 : i32
    %82 = arith.index_cast %80 : i32 to index
    %c0_41 = arith.constant 0 : index
    %c0_42 = arith.constant 0 : index
    %83 = vector.load %arg11[%82, %c0_41, %c0_42] : memref<4x8x48xf32, #tpu.memory_space<vmem>>, vector<1x8x48xf32>
    %84 = vector.shape_cast %83 : vector<1x8x48xf32> to vector<8x48xf32>
    %cst_43 = arith.constant dense<0.000000e+00> : vector<8x48xf32>
    %85 = tpu.matmul %77, %15, %cst_43 {dimension_numbers = #tpu.dot_dimension_numbers<[1], [0], [0], [1], [0, 0, 1, 1], [], []>} : vector<8x16xf32>, vector<16x48xf32>, vector<8x48xf32> -> vector<8x48xf32>
    %86 = vector.broadcast %17 : vector<1x48xf32> to vector<8x48xf32>
    %87 = arith.addf %85, %86 : vector<8x48xf32>
    %88 = vector.extract_strided_slice %84 {offsets = [0, 0], sizes = [8, 16], strides = [1, 1]} : vector<8x48xf32> to vector<8x16xf32>
    %89 = vector.extract_strided_slice %87 {offsets = [0, 0], sizes = [8, 16], strides = [1, 1]} : vector<8x48xf32> to vector<8x16xf32>
    %90 = arith.addf %88, %89 : vector<8x16xf32>
    %91 = arith.negf %90 : vector<8x16xf32>
    %92 = math.exp %91 : vector<8x16xf32>
    %cst_44 = arith.constant 1.000000e+00 : f32
    %93 = vector.broadcast %cst_44 : f32 to vector<8x16xf32>
    %94 = arith.addf %93, %92 : vector<8x16xf32>
    %95 = arith.divf %93, %94 : vector<8x16xf32>
    %96 = vector.extract_strided_slice %84 {offsets = [0, 16], sizes = [8, 16], strides = [1, 1]} : vector<8x48xf32> to vector<8x16xf32>
    %97 = vector.extract_strided_slice %87 {offsets = [0, 16], sizes = [8, 16], strides = [1, 1]} : vector<8x48xf32> to vector<8x16xf32>
    %98 = arith.addf %96, %97 : vector<8x16xf32>
    %99 = arith.negf %98 : vector<8x16xf32>
    %100 = math.exp %99 : vector<8x16xf32>
    %cst_45 = arith.constant 1.000000e+00 : f32
    %101 = vector.broadcast %cst_45 : f32 to vector<8x16xf32>
    %102 = arith.addf %101, %100 : vector<8x16xf32>
    %103 = arith.divf %101, %102 : vector<8x16xf32>
    %104 = vector.extract_strided_slice %84 {offsets = [0, 32], sizes = [8, 16], strides = [1, 1]} : vector<8x48xf32> to vector<8x16xf32>
    %105 = vector.extract_strided_slice %87 {offsets = [0, 32], sizes = [8, 16], strides = [1, 1]} : vector<8x48xf32> to vector<8x16xf32>
    %106 = arith.mulf %95, %105 : vector<8x16xf32>
    %107 = arith.addf %104, %106 : vector<8x16xf32>
    %108 = math.tanh %107 : vector<8x16xf32>
    %cst_46 = arith.constant 1.000000e+00 : f32
    %109 = vector.broadcast %cst_46 : f32 to vector<8x16xf32>
    %110 = arith.subf %109, %103 : vector<8x16xf32>
    %111 = arith.mulf %110, %108 : vector<8x16xf32>
    %112 = arith.mulf %103, %77 : vector<8x16xf32>
    %113 = arith.addf %111, %112 : vector<8x16xf32>
    %114 = vector.broadcast %81 : i32 to vector<8x1xi32>
    %115 = arith.cmpi slt, %114, %20 : vector<8x1xi32>
    %cst_47 = arith.constant 0.000000e+00 : f32
    %116 = vector.shape_cast %115 : vector<8x1xi1> to vector<8x1xi1>
    %117 = vector.broadcast %116 : vector<8x1xi1> to vector<8x16xi1>
    %118 = vector.broadcast %cst_47 : f32 to vector<8x16xf32>
    %119 = arith.select %117, %113, %118 : vector<8x16xi1>, vector<8x16xf32>
    %cst_48 = arith.constant dense<0.000000e+00> : vector<8x8xf32>
    %120 = tpu.matmul %119, %19, %cst_48 {dimension_numbers = #tpu.dot_dimension_numbers<[1], [0], [0], [1], [0, 0, 1, 1], [], []>} : vector<8x16xf32>, vector<16x8xf32>, vector<8x8xf32> -> vector<8x8xf32>
    %121 = arith.index_cast %80 : i32 to index
    %c0_49 = arith.constant 0 : index
    %c0_50 = arith.constant 0 : index
    %122 = vector.load %arg12[%121, %c0_49, %c0_50] : memref<4x8x8xf32, #tpu.memory_space<vmem>>, vector<1x8x8xf32>
    %123 = vector.shape_cast %122 : vector<1x8x8xf32> to vector<8x8xf32>
    %124 = vector.shape_cast %120 : vector<8x8xf32> to vector<1x8x8xf32>
    tpu.vector_store %arg12[%121, %c0_49, %c0_50], %124 {strides = array<i32>} : memref<4x8x8xf32, #tpu.memory_space<vmem>>, vector<1x8x8xf32>,
    %125 = vector.shape_cast %115 : vector<8x1xi1> to vector<8x1xi1>
    %126 = vector.broadcast %125 : vector<8x1xi1> to vector<8x16xi1>
    %127 = arith.select %126, %113, %77 : vector<8x16xi1>, vector<8x16xf32>
    %c2_i32 = arith.constant 2 : i32
    %c0_i32_51 = arith.constant 0 : i32
    %128 = arith.cmpi eq, %arg0, %c0_i32_51 : i32
    %c3_i32_52 = arith.constant 3 : i32
    %129 = arith.subi %c3_i32_52, %c2_i32 : i32
    %130 = arith.select %128, %c2_i32, %129 : i32
    %131 = arith.addi %26, %130 : i32
    %132 = arith.index_cast %130 : i32 to index
    %c0_53 = arith.constant 0 : index
    %c0_54 = arith.constant 0 : index
    %133 = vector.load %arg11[%132, %c0_53, %c0_54] : memref<4x8x48xf32, #tpu.memory_space<vmem>>, vector<1x8x48xf32>
    %134 = vector.shape_cast %133 : vector<1x8x48xf32> to vector<8x48xf32>
    %cst_55 = arith.constant dense<0.000000e+00> : vector<8x48xf32>
    %135 = tpu.matmul %127, %15, %cst_55 {dimension_numbers = #tpu.dot_dimension_numbers<[1], [0], [0], [1], [0, 0, 1, 1], [], []>} : vector<8x16xf32>, vector<16x48xf32>, vector<8x48xf32> -> vector<8x48xf32>
    %136 = vector.broadcast %17 : vector<1x48xf32> to vector<8x48xf32>
    %137 = arith.addf %135, %136 : vector<8x48xf32>
    %138 = vector.extract_strided_slice %134 {offsets = [0, 0], sizes = [8, 16], strides = [1, 1]} : vector<8x48xf32> to vector<8x16xf32>
    %139 = vector.extract_strided_slice %137 {offsets = [0, 0], sizes = [8, 16], strides = [1, 1]} : vector<8x48xf32> to vector<8x16xf32>
    %140 = arith.addf %138, %139 : vector<8x16xf32>
    %141 = arith.negf %140 : vector<8x16xf32>
    %142 = math.exp %141 : vector<8x16xf32>
    %cst_56 = arith.constant 1.000000e+00 : f32
    %143 = vector.broadcast %cst_56 : f32 to vector<8x16xf32>
    %144 = arith.addf %143, %142 : vector<8x16xf32>
    %145 = arith.divf %143, %144 : vector<8x16xf32>
    %146 = vector.extract_strided_slice %134 {offsets = [0, 16], sizes = [8, 16], strides = [1, 1]} : vector<8x48xf32> to vector<8x16xf32>
    %147 = vector.extract_strided_slice %137 {offsets = [0, 16], sizes = [8, 16], strides = [1, 1]} : vector<8x48xf32> to vector<8x16xf32>
    %148 = arith.addf %146, %147 : vector<8x16xf32>
    %149 = arith.negf %148 : vector<8x16xf32>
    %150 = math.exp %149 : vector<8x16xf32>
    %cst_57 = arith.constant 1.000000e+00 : f32
    %151 = vector.broadcast %cst_57 : f32 to vector<8x16xf32>
    %152 = arith.addf %151, %150 : vector<8x16xf32>
    %153 = arith.divf %151, %152 : vector<8x16xf32>
    %154 = vector.extract_strided_slice %134 {offsets = [0, 32], sizes = [8, 16], strides = [1, 1]} : vector<8x48xf32> to vector<8x16xf32>
    %155 = vector.extract_strided_slice %137 {offsets = [0, 32], sizes = [8, 16], strides = [1, 1]} : vector<8x48xf32> to vector<8x16xf32>
    %156 = arith.mulf %145, %155 : vector<8x16xf32>
    %157 = arith.addf %154, %156 : vector<8x16xf32>
    %158 = math.tanh %157 : vector<8x16xf32>
    %cst_58 = arith.constant 1.000000e+00 : f32
    %159 = vector.broadcast %cst_58 : f32 to vector<8x16xf32>
    %160 = arith.subf %159, %153 : vector<8x16xf32>
    %161 = arith.mulf %160, %158 : vector<8x16xf32>
    %162 = arith.mulf %153, %127 : vector<8x16xf32>
    %163 = arith.addf %161, %162 : vector<8x16xf32>
    %164 = vector.broadcast %131 : i32 to vector<8x1xi32>
    %165 = arith.cmpi slt, %164, %20 : vector<8x1xi32>
    %cst_59 = arith.constant 0.000000e+00 : f32
    %166 = vector.shape_cast %165 : vector<8x1xi1> to vector<8x1xi1>
    %167 = vector.broadcast %166 : vector<8x1xi1> to vector<8x16xi1>
    %168 = vector.broadcast %cst_59 : f32 to vector<8x16xf32>
    %169 = arith.select %167, %163, %168 : vector<8x16xi1>, vector<8x16xf32>
    %cst_60 = arith.constant dense<0.000000e+00> : vector<8x8xf32>
    %170 = tpu.matmul %169, %19, %cst_60 {dimension_numbers = #tpu.dot_dimension_numbers<[1], [0], [0], [1], [0, 0, 1, 1], [], []>} : vector<8x16xf32>, vector<16x8xf32>, vector<8x8xf32> -> vector<8x8xf32>
    %171 = arith.index_cast %130 : i32 to index
    %c0_61 = arith.constant 0 : index
    %c0_62 = arith.constant 0 : index
    %172 = vector.load %arg12[%171, %c0_61, %c0_62] : memref<4x8x8xf32, #tpu.memory_space<vmem>>, vector<1x8x8xf32>
    %173 = vector.shape_cast %172 : vector<1x8x8xf32> to vector<8x8xf32>
    %174 = vector.shape_cast %170 : vector<8x8xf32> to vector<1x8x8xf32>
    tpu.vector_store %arg12[%171, %c0_61, %c0_62], %174 {strides = array<i32>} : memref<4x8x8xf32, #tpu.memory_space<vmem>>, vector<1x8x8xf32>,
    %175 = vector.shape_cast %165 : vector<8x1xi1> to vector<8x1xi1>
    %176 = vector.broadcast %175 : vector<8x1xi1> to vector<8x16xi1>
    %177 = arith.select %176, %163, %127 : vector<8x16xi1>, vector<8x16xf32>
    %c3_i32_63 = arith.constant 3 : i32
    %c0_i32_64 = arith.constant 0 : i32
    %178 = arith.cmpi eq, %arg0, %c0_i32_64 : i32
    %c3_i32_65 = arith.constant 3 : i32
    %179 = arith.subi %c3_i32_65, %c3_i32_63 : i32
    %180 = arith.select %178, %c3_i32_63, %179 : i32
    %181 = arith.addi %26, %180 : i32
    %182 = arith.index_cast %180 : i32 to index
    %c0_66 = arith.constant 0 : index
    %c0_67 = arith.constant 0 : index
    %183 = vector.load %arg11[%182, %c0_66, %c0_67] : memref<4x8x48xf32, #tpu.memory_space<vmem>>, vector<1x8x48xf32>
    %184 = vector.shape_cast %183 : vector<1x8x48xf32> to vector<8x48xf32>
    %cst_68 = arith.constant dense<0.000000e+00> : vector<8x48xf32>
    %185 = tpu.matmul %177, %15, %cst_68 {dimension_numbers = #tpu.dot_dimension_numbers<[1], [0], [0], [1], [0, 0, 1, 1], [], []>} : vector<8x16xf32>, vector<16x48xf32>, vector<8x48xf32> -> vector<8x48xf32>
    %186 = vector.broadcast %17 : vector<1x48xf32> to vector<8x48xf32>
    %187 = arith.addf %185, %186 : vector<8x48xf32>
    %188 = vector.extract_strided_slice %184 {offsets = [0, 0], sizes = [8, 16], strides = [1, 1]} : vector<8x48xf32> to vector<8x16xf32>
    %189 = vector.extract_strided_slice %187 {offsets = [0, 0], sizes = [8, 16], strides = [1, 1]} : vector<8x48xf32> to vector<8x16xf32>
    %190 = arith.addf %188, %189 : vector<8x16xf32>
    %191 = arith.negf %190 : vector<8x16xf32>
    %192 = math.exp %191 : vector<8x16xf32>
    %cst_69 = arith.constant 1.000000e+00 : f32
    %193 = vector.broadcast %cst_69 : f32 to vector<8x16xf32>
    %194 = arith.addf %193, %192 : vector<8x16xf32>
    %195 = arith.divf %193, %194 : vector<8x16xf32>
    %196 = vector.extract_strided_slice %184 {offsets = [0, 16], sizes = [8, 16], strides = [1, 1]} : vector<8x48xf32> to vector<8x16xf32>
    %197 = vector.extract_strided_slice %187 {offsets = [0, 16], sizes = [8, 16], strides = [1, 1]} : vector<8x48xf32> to vector<8x16xf32>
    %198 = arith.addf %196, %197 : vector<8x16xf32>
    %199 = arith.negf %198 : vector<8x16xf32>
    %200 = math.exp %199 : vector<8x16xf32>
    %cst_70 = arith.constant 1.000000e+00 : f32
    %201 = vector.broadcast %cst_70 : f32 to vector<8x16xf32>
    %202 = arith.addf %201, %200 : vector<8x16xf32>
    %203 = arith.divf %201, %202 : vector<8x16xf32>
    %204 = vector.extract_strided_slice %184 {offsets = [0, 32], sizes = [8, 16], strides = [1, 1]} : vector<8x48xf32> to vector<8x16xf32>
    %205 = vector.extract_strided_slice %187 {offsets = [0, 32], sizes = [8, 16], strides = [1, 1]} : vector<8x48xf32> to vector<8x16xf32>
    %206 = arith.mulf %195, %205 : vector<8x16xf32>
    %207 = arith.addf %204, %206 : vector<8x16xf32>
    %208 = math.tanh %207 : vector<8x16xf32>
    %cst_71 = arith.constant 1.000000e+00 : f32
    %209 = vector.broadcast %cst_71 : f32 to vector<8x16xf32>
    %210 = arith.subf %209, %203 : vector<8x16xf32>
    %211 = arith.mulf %210, %208 : vector<8x16xf32>
    %212 = arith.mulf %203, %177 : vector<8x16xf32>
    %213 = arith.addf %211, %212 : vector<8x16xf32>
    %214 = vector.broadcast %181 : i32 to vector<8x1xi32>
    %215 = arith.cmpi slt, %214, %20 : vector<8x1xi32>
    %cst_72 = arith.constant 0.000000e+00 : f32
    %216 = vector.shape_cast %215 : vector<8x1xi1> to vector<8x1xi1>
    %217 = vector.broadcast %216 : vector<8x1xi1> to vector<8x16xi1>
    %218 = vector.broadcast %cst_72 : f32 to vector<8x16xf32>
    %219 = arith.select %217, %213, %218 : vector<8x16xi1>, vector<8x16xf32>
    %cst_73 = arith.constant dense<0.000000e+00> : vector<8x8xf32>
    %220 = tpu.matmul %219, %19, %cst_73 {dimension_numbers = #tpu.dot_dimension_numbers<[1], [0], [0], [1], [0, 0, 1, 1], [], []>} : vector<8x16xf32>, vector<16x8xf32>, vector<8x8xf32> -> vector<8x8xf32>
    %221 = arith.index_cast %180 : i32 to index
    %c0_74 = arith.constant 0 : index
    %c0_75 = arith.constant 0 : index
    %222 = vector.load %arg12[%221, %c0_74, %c0_75] : memref<4x8x8xf32, #tpu.memory_space<vmem>>, vector<1x8x8xf32>
    %223 = vector.shape_cast %222 : vector<1x8x8xf32> to vector<8x8xf32>
    %224 = vector.shape_cast %220 : vector<8x8xf32> to vector<1x8x8xf32>
    tpu.vector_store %arg12[%221, %c0_74, %c0_75], %224 {strides = array<i32>} : memref<4x8x8xf32, #tpu.memory_space<vmem>>, vector<1x8x8xf32>,
    %225 = vector.shape_cast %215 : vector<8x1xi1> to vector<8x1xi1>
    %226 = vector.broadcast %225 : vector<8x1xi1> to vector<8x16xi1>
    %227 = arith.select %226, %213, %177 : vector<8x16xi1>, vector<8x16xf32>
    %c4_i32_76 = arith.constant 4 : i32
    %c0_77 = arith.constant 0 : index
    %c0_78 = arith.constant 0 : index
    %228 = vector.load %arg10[%c0_77, %c0_78] : memref<8x16xf32, #tpu.memory_space<vmem>>, vector<8x16xf32>
    tpu.vector_store %arg10[%c0_77, %c0_78], %227 {strides = array<i32>} : memref<8x16xf32, #tpu.memory_space<vmem>>, vector<8x16xf32>,
    %c0_79 = arith.constant 0 : index
    %c0_80 = arith.constant 0 : index
    %c0_81 = arith.constant 0 : index
    %229 = vector.load %arg12[%c0_79, %c0_80, %c0_81] : memref<4x8x8xf32, #tpu.memory_space<vmem>>, vector<4x8x8xf32>
    %c0_82 = arith.constant 0 : index
    %c0_83 = arith.constant 0 : index
    %c0_84 = arith.constant 0 : index
    %c0_85 = arith.constant 0 : index
    %230 = vector.load %arg9[%c0_82, %c0_83, %c0_84, %c0_85] : memref<1x4x8x8xf32, #tpu.memory_space<vmem>>, vector<1x4x8x8xf32>
    %231 = vector.shape_cast %230 : vector<1x4x8x8xf32> to vector<4x8x8xf32>
    %232 = vector.shape_cast %229 : vector<4x8x8xf32> to vector<1x4x8x8xf32>
    tpu.vector_store %arg9[%c0_82, %c0_83, %c0_84, %c0_85], %232 {strides = array<i32>} : memref<1x4x8x8xf32, #tpu.memory_space<vmem>>, vector<1x4x8x8xf32>,
    return
  }
  func.func @transform_0(%arg0: i32, %arg1: i32) -> (i32, i32, i32) {
    %c1_i32 = arith.constant 1 : i32
    %0 = arith.subi %c1_i32, %arg1 : i32
    %1 = arith.muli %arg0, %0 : i32
    %c1_i32_0 = arith.constant 1 : i32
    %2 = arith.subi %c1_i32_0, %arg0 : i32
    %3 = arith.muli %2, %arg1 : i32
    %4 = arith.addi %1, %3 : i32
    %c0_i32 = arith.constant 0 : i32
    %c0_i32_1 = arith.constant 0 : i32
    %c0_i32_2 = arith.constant 0 : i32
    return %4, %c0_i32, %c0_i32_1 : i32, i32, i32
  }
  func.func @transform_1(%arg0: i32, %arg1: i32) -> (i32, i32) {
    %c0_i32 = arith.constant 0 : i32
    %c0_i32_0 = arith.constant 0 : i32
    %c0_i32_1 = arith.constant 0 : i32
    return %c0_i32, %c0_i32_0 : i32, i32
  }
  func.func @transform_2(%arg0: i32, %arg1: i32) -> (i32, i32, i32) {
    %c0_i32 = arith.constant 0 : i32
    %c0_i32_0 = arith.constant 0 : i32
    %c0_i32_1 = arith.constant 0 : i32
    return %arg0, %c0_i32, %c0_i32_0 : i32, i32, i32
  }
  func.func @transform_3(%arg0: i32, %arg1: i32) -> (i32, i32, i32) {
    %c0_i32 = arith.constant 0 : i32
    %c0_i32_0 = arith.constant 0 : i32
    %c0_i32_1 = arith.constant 0 : i32
    return %arg0, %c0_i32, %c0_i32_0 : i32, i32, i32
  }
  func.func @transform_4(%arg0: i32, %arg1: i32) -> (i32, i32, i32) {
    %c0_i32 = arith.constant 0 : i32
    %c0_i32_0 = arith.constant 0 : i32
    %c0_i32_1 = arith.constant 0 : i32
    return %arg0, %c0_i32, %c0_i32_0 : i32, i32, i32
  }
  func.func @transform_5(%arg0: i32, %arg1: i32) -> (i32, i32, i32) {
    %c0_i32 = arith.constant 0 : i32
    %c0_i32_0 = arith.constant 0 : i32
    %c0_i32_1 = arith.constant 0 : i32
    return %arg0, %c0_i32, %c0_i32_0 : i32, i32, i32
  }
  func.func @transform_6(%arg0: i32, %arg1: i32) -> (i32, i32, i32) {
    %c0_i32 = arith.constant 0 : i32
    %c0_i32_0 = arith.constant 0 : i32
    %c0_i32_1 = arith.constant 0 : i32
    return %arg0, %c0_i32, %c0_i32_0 : i32, i32, i32
  }
  func.func @transform_7(%arg0: i32, %arg1: i32) -> (i32, i32, i32, i32) {
    %c1_i32 = arith.constant 1 : i32
    %0 = arith.subi %c1_i32, %arg1 : i32
    %1 = arith.muli %arg0, %0 : i32
    %c1_i32_0 = arith.constant 1 : i32
    %2 = arith.subi %c1_i32_0, %arg0 : i32
    %3 = arith.muli %2, %arg1 : i32
    %4 = arith.addi %1, %3 : i32
    %c0_i32 = arith.constant 0 : i32
    %c0_i32_1 = arith.constant 0 : i32
    %c0_i32_2 = arith.constant 0 : i32
    return %arg0, %4, %c0_i32, %c0_i32_1 : i32, i32, i32, i32
  }
}

module attributes {stable_mosaic.version = 11 : i64} {
  func.func @bigru_tag_kernel(%arg0: i32, %arg1: i32, %arg2: memref<4x8x16xf32, #tpu.memory_space<vmem>>, %arg3: memref<8x1xi32, #tpu.memory_space<vmem>>, %arg4: memref<1x16x48xf32, #tpu.memory_space<vmem>>, %arg5: memref<1x16x48xf32, #tpu.memory_space<vmem>>, %arg6: memref<1x1x48xf32, #tpu.memory_space<vmem>>, %arg7: memref<1x1x48xf32, #tpu.memory_space<vmem>>, %arg8: memref<1x16x8xf32, #tpu.memory_space<vmem>>, %arg9: memref<1x4x8x8xf32, #tpu.memory_space<vmem>>, %arg10: memref<8x16xf32, #tpu.memory_space<vmem>>, %arg11: memref<4x8x48xf32, #tpu.memory_space<vmem>>, %arg12: memref<4x8x8xf32, #tpu.memory_space<vmem>>) attributes {dimension_semantics = [#tpu.dimension_semantics<parallel>, #tpu.dimension_semantics<arbitrary>], iteration_bounds = array<i64: 2, 2>, scalar_prefetch = 0 : i64, scratch_operands = 3 : i64, tpu.core_type = #tpu.core_type<tc>, window_params = [{transform_indices = @transform_0, window_bounds = array<i64: 4, 8, 16>}, {pipeline_mode = #tpu.pipeline_mode<synchronous>, transform_indices = @transform_1, window_bounds = array<i64: 8, 1>}, {transform_indices = @transform_2, window_bounds = array<i64: 1, 16, 48>}, {transform_indices = @transform_3, window_bounds = array<i64: 1, 16, 48>}, {transform_indices = @transform_4, window_bounds = array<i64: 1, 1, 48>}, {transform_indices = @transform_5, window_bounds = array<i64: 1, 1, 48>}, {transform_indices = @transform_6, window_bounds = array<i64: 1, 16, 8>}, {transform_indices = @transform_7, window_bounds = array<i64: 1, 4, 8, 8>}]} {
    %c0_i32 = arith.constant 0 : i32
    %0 = arith.cmpi eq, %arg1, %c0_i32 : i32
    %1 = arith.extui %0 : i1 to i32
    %c0_i32_0 = arith.constant 0 : i32
    %2 = arith.cmpi ne, %1, %c0_i32_0 : i32
    scf.if %2 {
      %cst_86 = arith.constant 0.000000e+00 : f32
      %233 = vector.broadcast %cst_86 : f32 to vector<8x16xf32>
      %c0_87 = arith.constant 0 : index
      %c0_88 = arith.constant 0 : index
      %234 = vector.load %arg10[%c0_87, %c0_88] : memref<8x16xf32, #tpu.memory_space<vmem>>, vector<8x16xf32>
      tpu.vector_store %arg10[%c0_87, %c0_88], %233 {strides = array<i32>} : memref<8x16xf32, #tpu.memory_space<vmem>>, vector<8x16xf32>,
    } else {
    }
    %c0 = arith.constant 0 : index
    %c0_1 = arith.constant 0 : index
    %c0_2 = arith.constant 0 : index
    %3 = vector.load %arg2[%c0, %c0_1, %c0_2] : memref<4x8x16xf32, #tpu.memory_space<vmem>>, vector<4x8x16xf32>
    %4 = vector.shape_cast %3 : vector<4x8x16xf32> to vector<32x16xf32>
    %c0_3 = arith.constant 0 : index
    %c0_4 = arith.constant 0 : index
    %c0_5 = arith.constant 0 : index
    %5 = vector.load %arg4[%c0_3, %c0_4, %c0_5] : memref<1x16x48xf32, #tpu.memory_space<vmem>>, vector<1x16x48xf32>
    %6 = vector.shape_cast %5 : vector<1x16x48xf32> to vector<16x48xf32>
    %cst = arith.constant dense<0.000000e+00> : vector<32x48xf32>
    %7 = tpu.matmul %4, %6, %cst {dimension_numbers = #tpu.dot_dimension_numbers<[1], [0], [0], [1], [0, 0, 1, 1], [], []>} : vector<32x16xf32>, vector<16x48xf32>, vector<32x48xf32> -> vector<32x48xf32>
    %c0_6 = arith.constant 0 : index
    %c0_7 = arith.constant 0 : index
    %c0_8 = arith.constant 0 : index
    %8 = vector.load %arg6[%c0_6, %c0_7, %c0_8] : memref<1x1x48xf32, #tpu.memory_space<vmem>>, vector<1x1x48xf32>
    %9 = vector.shape_cast %8 : vector<1x1x48xf32> to vector<1x48xf32>
    %10 = vector.broadcast %9 : vector<1x48xf32> to vector<32x48xf32>
    %11 = arith.addf %7, %10 : vector<32x48xf32>
    %12 = vector.shape_cast %11 : vector<32x48xf32> to vector<4x8x48xf32>
    %c0_9 = arith.constant 0 : index
    %c0_10 = arith.constant 0 : index
    %c0_11 = arith.constant 0 : index
    %13 = vector.load %arg11[%c0_9, %c0_10, %c0_11] : memref<4x8x48xf32, #tpu.memory_space<vmem>>, vector<4x8x48xf32>
    tpu.vector_store %arg11[%c0_9, %c0_10, %c0_11], %12 {strides = array<i32>} : memref<4x8x48xf32, #tpu.memory_space<vmem>>, vector<4x8x48xf32>,
    %c0_12 = arith.constant 0 : index
    %c0_13 = arith.constant 0 : index
    %c0_14 = arith.constant 0 : index
    %14 = vector.load %arg5[%c0_12, %c0_13, %c0_14] : memref<1x16x48xf32, #tpu.memory_space<vmem>>, vector<1x16x48xf32>
    %15 = vector.shape_cast %14 : vector<1x16x48xf32> to vector<16x48xf32>
    %c0_15 = arith.constant 0 : index
    %c0_16 = arith.constant 0 : index
    %c0_17 = arith.constant 0 : index
    %16 = vector.load %arg7[%c0_15, %c0_16, %c0_17] : memref<1x1x48xf32, #tpu.memory_space<vmem>>, vector<1x1x48xf32>
    %17 = vector.shape_cast %16 : vector<1x1x48xf32> to vector<1x48xf32>
    %c0_18 = arith.constant 0 : index
    %c0_19 = arith.constant 0 : index
    %c0_20 = arith.constant 0 : index
    %18 = vector.load %arg8[%c0_18, %c0_19, %c0_20] : memref<1x16x8xf32, #tpu.memory_space<vmem>>, vector<1x16x8xf32>
    %19 = vector.shape_cast %18 : vector<1x16x8xf32> to vector<16x8xf32>
    %c0_21 = arith.constant 0 : index
    %c0_22 = arith.constant 0 : index
    %20 = vector.load %arg3[%c0_21, %c0_22] : memref<8x1xi32, #tpu.memory_space<vmem>>, vector<8x1xi32>
    %c1_i32 = arith.constant 1 : i32
    %21 = arith.subi %c1_i32, %arg1 : i32
    %22 = arith.muli %arg0, %21 : i32
    %c1_i32_23 = arith.constant 1 : i32
    %23 = arith.subi %c1_i32_23, %arg0 : i32
    %24 = arith.muli %23, %arg1 : i32
    %25 = arith.addi %22, %24 : i32
    %c4_i32 = arith.constant 4 : i32
    %26 = arith.muli %25, %c4_i32 : i32
    %c0_24 = arith.constant 0 : index
    %c0_25 = arith.constant 0 : index
    %27 = vector.load %arg10[%c0_24, %c0_25] : memref<8x16xf32, #tpu.memory_space<vmem>>, vector<8x16xf32>
    %c0_i32_26 = arith.constant 0 : i32
    %c0_i32_27 = arith.constant 0 : i32
    %28 = arith.cmpi eq, %arg0, %c0_i32_27 : i32
    %c3_i32 = arith.constant 3 : i32
    %29 = arith.subi %c3_i32, %c0_i32_26 : i32
    %30 = arith.select %28, %c0_i32_26, %29 : i32
    %31 = arith.addi %26, %30 : i32
    %32 = arith.index_cast %30 : i32 to index
    %c0_28 = arith.constant 0 : index
    %c0_29 = arith.constant 0 : index
    %33 = vector.load %arg11[%32, %c0_28, %c0_29] : memref<4x8x48xf32, #tpu.memory_space<vmem>>, vector<1x8x48xf32>
    %34 = vector.shape_cast %33 : vector<1x8x48xf32> to vector<8x48xf32>
    %cst_30 = arith.constant dense<0.000000e+00> : vector<8x48xf32>
    %35 = tpu.matmul %27, %15, %cst_30 {dimension_numbers = #tpu.dot_dimension_numbers<[1], [0], [0], [1], [0, 0, 1, 1], [], []>} : vector<8x16xf32>, vector<16x48xf32>, vector<8x48xf32> -> vector<8x48xf32>
    %36 = vector.broadcast %17 : vector<1x48xf32> to vector<8x48xf32>
    %37 = arith.addf %35, %36 : vector<8x48xf32>
    %38 = vector.extract_strided_slice %34 {offsets = [0, 0], sizes = [8, 16], strides = [1, 1]} : vector<8x48xf32> to vector<8x16xf32>
    %39 = vector.extract_strided_slice %37 {offsets = [0, 0], sizes = [8, 16], strides = [1, 1]} : vector<8x48xf32> to vector<8x16xf32>
    %40 = arith.addf %38, %39 : vector<8x16xf32>
    %41 = arith.negf %40 : vector<8x16xf32>
    %42 = math.exp %41 : vector<8x16xf32>
    %cst_31 = arith.constant 1.000000e+00 : f32
    %43 = vector.broadcast %cst_31 : f32 to vector<8x16xf32>
    %44 = arith.addf %43, %42 : vector<8x16xf32>
    %45 = arith.divf %43, %44 : vector<8x16xf32>
    %46 = vector.extract_strided_slice %34 {offsets = [0, 16], sizes = [8, 16], strides = [1, 1]} : vector<8x48xf32> to vector<8x16xf32>
    %47 = vector.extract_strided_slice %37 {offsets = [0, 16], sizes = [8, 16], strides = [1, 1]} : vector<8x48xf32> to vector<8x16xf32>
    %48 = arith.addf %46, %47 : vector<8x16xf32>
    %49 = arith.negf %48 : vector<8x16xf32>
    %50 = math.exp %49 : vector<8x16xf32>
    %cst_32 = arith.constant 1.000000e+00 : f32
    %51 = vector.broadcast %cst_32 : f32 to vector<8x16xf32>
    %52 = arith.addf %51, %50 : vector<8x16xf32>
    %53 = arith.divf %51, %52 : vector<8x16xf32>
    %54 = vector.extract_strided_slice %34 {offsets = [0, 32], sizes = [8, 16], strides = [1, 1]} : vector<8x48xf32> to vector<8x16xf32>
    %55 = vector.extract_strided_slice %37 {offsets = [0, 32], sizes = [8, 16], strides = [1, 1]} : vector<8x48xf32> to vector<8x16xf32>
    %56 = arith.mulf %45, %55 : vector<8x16xf32>
    %57 = arith.addf %54, %56 : vector<8x16xf32>
    %58 = math.tanh %57 : vector<8x16xf32>
    %cst_33 = arith.constant 1.000000e+00 : f32
    %59 = vector.broadcast %cst_33 : f32 to vector<8x16xf32>
    %60 = arith.subf %59, %53 : vector<8x16xf32>
    %61 = arith.mulf %60, %58 : vector<8x16xf32>
    %62 = arith.mulf %53, %27 : vector<8x16xf32>
    %63 = arith.addf %61, %62 : vector<8x16xf32>
    %64 = vector.broadcast %31 : i32 to vector<8x1xi32>
    %65 = arith.cmpi slt, %64, %20 : vector<8x1xi32>
    %cst_34 = arith.constant 0.000000e+00 : f32
    %66 = vector.shape_cast %65 : vector<8x1xi1> to vector<8x1xi1>
    %67 = vector.broadcast %66 : vector<8x1xi1> to vector<8x16xi1>
    %68 = vector.broadcast %cst_34 : f32 to vector<8x16xf32>
    %69 = arith.select %67, %63, %68 : vector<8x16xi1>, vector<8x16xf32>
    %cst_35 = arith.constant dense<0.000000e+00> : vector<8x8xf32>
    %70 = tpu.matmul %69, %19, %cst_35 {dimension_numbers = #tpu.dot_dimension_numbers<[1], [0], [0], [1], [0, 0, 1, 1], [], []>} : vector<8x16xf32>, vector<16x8xf32>, vector<8x8xf32> -> vector<8x8xf32>
    %71 = arith.index_cast %30 : i32 to index
    %c0_36 = arith.constant 0 : index
    %c0_37 = arith.constant 0 : index
    %72 = vector.load %arg12[%71, %c0_36, %c0_37] : memref<4x8x8xf32, #tpu.memory_space<vmem>>, vector<1x8x8xf32>
    %73 = vector.shape_cast %72 : vector<1x8x8xf32> to vector<8x8xf32>
    %74 = vector.shape_cast %70 : vector<8x8xf32> to vector<1x8x8xf32>
    tpu.vector_store %arg12[%71, %c0_36, %c0_37], %74 {strides = array<i32>} : memref<4x8x8xf32, #tpu.memory_space<vmem>>, vector<1x8x8xf32>,
    %75 = vector.shape_cast %65 : vector<8x1xi1> to vector<8x1xi1>
    %76 = vector.broadcast %75 : vector<8x1xi1> to vector<8x16xi1>
    %77 = arith.select %76, %63, %27 : vector<8x16xi1>, vector<8x16xf32>
    %c1_i32_38 = arith.constant 1 : i32
    %c0_i32_39 = arith.constant 0 : i32
    %78 = arith.cmpi eq, %arg0, %c0_i32_39 : i32
    %c3_i32_40 = arith.constant 3 : i32
    %79 = arith.subi %c3_i32_40, %c1_i32_38 : i32
    %80 = arith.select %78, %c1_i32_38, %79 : i32
    %81 = arith.addi %26, %80 : i32
    %82 = arith.index_cast %80 : i32 to index
    %c0_41 = arith.constant 0 : index
    %c0_42 = arith.constant 0 : index
    %83 = vector.load %arg11[%82, %c0_41, %c0_42] : memref<4x8x48xf32, #tpu.memory_space<vmem>>, vector<1x8x48xf32>
    %84 = vector.shape_cast %83 : vector<1x8x48xf32> to vector<8x48xf32>
    %cst_43 = arith.constant dense<0.000000e+00> : vector<8x48xf32>
    %85 = tpu.matmul %77, %15, %cst_43 {dimension_numbers = #tpu.dot_dimension_numbers<[1], [0], [0], [1], [0, 0, 1, 1], [], []>} : vector<8x16xf32>, vector<16x48xf32>, vector<8x48xf32> -> vector<8x48xf32>
    %86 = vector.broadcast %17 : vector<1x48xf32> to vector<8x48xf32>
    %87 = arith.addf %85, %86 : vector<8x48xf32>
    %88 = vector.extract_strided_slice %84 {offsets = [0, 0], sizes = [8, 16], strides = [1, 1]} : vector<8x48xf32> to vector<8x16xf32>
    %89 = vector.extract_strided_slice %87 {offsets = [0, 0], sizes = [8, 16], strides = [1, 1]} : vector<8x48xf32> to vector<8x16xf32>
    %90 = arith.addf %88, %89 : vector<8x16xf32>
    %91 = arith.negf %90 : vector<8x16xf32>
    %92 = math.exp %91 : vector<8x16xf32>
    %cst_44 = arith.constant 1.000000e+00 : f32
    %93 = vector.broadcast %cst_44 : f32 to vector<8x16xf32>
    %94 = arith.addf %93, %92 : vector<8x16xf32>
    %95 = arith.divf %93, %94 : vector<8x16xf32>
    %96 = vector.extract_strided_slice %84 {offsets = [0, 16], sizes = [8, 16], strides = [1, 1]} : vector<8x48xf32> to vector<8x16xf32>
    %97 = vector.extract_strided_slice %87 {offsets = [0, 16], sizes = [8, 16], strides = [1, 1]} : vector<8x48xf32> to vector<8x16xf32>
    %98 = arith.addf %96, %97 : vector<8x16xf32>
    %99 = arith.negf %98 : vector<8x16xf32>
    %100 = math.exp %99 : vector<8x16xf32>
    %cst_45 = arith.constant 1.000000e+00 : f32
    %101 = vector.broadcast %cst_45 : f32 to vector<8x16xf32>
    %102 = arith.addf %101, %100 : vector<8x16xf32>
    %103 = arith.divf %101, %102 : vector<8x16xf32>
    %104 = vector.extract_strided_slice %84 {offsets = [0, 32], sizes = [8, 16], strides = [1, 1]} : vector<8x48xf32> to vector<8x16xf32>
    %105 = vector.extract_strided_slice %87 {offsets = [0, 32], sizes = [8, 16], strides = [1, 1]} : vector<8x48xf32> to vector<8x16xf32>
    %106 = arith.mulf %95, %105 : vector<8x16xf32>
    %107 = arith.addf %104, %106 : vector<8x16xf32>
    %108 = math.tanh %107 : vector<8x16xf32>
    %cst_46 = arith.constant 1.000000e+00 : f32
    %109 = vector.broadcast %cst_46 : f32 to vector<8x16xf32>
    %110 = arith.subf %109, %103 : vector<8x16xf32>
    %111 = arith.mulf %110, %108 : vector<8x16xf32>
    %112 = arith.mulf %103, %77 : vector<8x16xf32>
    %113 = arith.addf %111, %112 : vector<8x16xf32>
    %114 = vector.broadcast %81 : i32 to vector<8x1xi32>
    %115 = arith.cmpi slt, %114, %20 : vector<8x1xi32>
    %cst_47 = arith.constant 0.000000e+00 : f32
    %116 = vector.shape_cast %115 : vector<8x1xi1> to vector<8x1xi1>
    %117 = vector.broadcast %116 : vector<8x1xi1> to vector<8x16xi1>
    %118 = vector.broadcast %cst_47 : f32 to vector<8x16xf32>
    %119 = arith.select %117, %113, %118 : vector<8x16xi1>, vector<8x16xf32>
    %cst_48 = arith.constant dense<0.000000e+00> : vector<8x8xf32>
    %120 = tpu.matmul %119, %19, %cst_48 {dimension_numbers = #tpu.dot_dimension_numbers<[1], [0], [0], [1], [0, 0, 1, 1], [], []>} : vector<8x16xf32>, vector<16x8xf32>, vector<8x8xf32> -> vector<8x8xf32>
    %121 = arith.index_cast %80 : i32 to index
    %c0_49 = arith.constant 0 : index
    %c0_50 = arith.constant 0 : index
    %122 = vector.load %arg12[%121, %c0_49, %c0_50] : memref<4x8x8xf32, #tpu.memory_space<vmem>>, vector<1x8x8xf32>
    %123 = vector.shape_cast %122 : vector<1x8x8xf32> to vector<8x8xf32>
    %124 = vector.shape_cast %120 : vector<8x8xf32> to vector<1x8x8xf32>
    tpu.vector_store %arg12[%121, %c0_49, %c0_50], %124 {strides = array<i32>} : memref<4x8x8xf32, #tpu.memory_space<vmem>>, vector<1x8x8xf32>,
    %125 = vector.shape_cast %115 : vector<8x1xi1> to vector<8x1xi1>
    %126 = vector.broadcast %125 : vector<8x1xi1> to vector<8x16xi1>
    %127 = arith.select %126, %113, %77 : vector<8x16xi1>, vector<8x16xf32>
    %c2_i32 = arith.constant 2 : i32
    %c0_i32_51 = arith.constant 0 : i32
    %128 = arith.cmpi eq, %arg0, %c0_i32_51 : i32
    %c3_i32_52 = arith.constant 3 : i32
    %129 = arith.subi %c3_i32_52, %c2_i32 : i32
    %130 = arith.select %128, %c2_i32, %129 : i32
    %131 = arith.addi %26, %130 : i32
    %132 = arith.index_cast %130 : i32 to index
    %c0_53 = arith.constant 0 : index
    %c0_54 = arith.constant 0 : index
    %133 = vector.load %arg11[%132, %c0_53, %c0_54] : memref<4x8x48xf32, #tpu.memory_space<vmem>>, vector<1x8x48xf32>
    %134 = vector.shape_cast %133 : vector<1x8x48xf32> to vector<8x48xf32>
    %cst_55 = arith.constant dense<0.000000e+00> : vector<8x48xf32>
    %135 = tpu.matmul %127, %15, %cst_55 {dimension_numbers = #tpu.dot_dimension_numbers<[1], [0], [0], [1], [0, 0, 1, 1], [], []>} : vector<8x16xf32>, vector<16x48xf32>, vector<8x48xf32> -> vector<8x48xf32>
    %136 = vector.broadcast %17 : vector<1x48xf32> to vector<8x48xf32>
    %137 = arith.addf %135, %136 : vector<8x48xf32>
    %138 = vector.extract_strided_slice %134 {offsets = [0, 0], sizes = [8, 16], strides = [1, 1]} : vector<8x48xf32> to vector<8x16xf32>
    %139 = vector.extract_strided_slice %137 {offsets = [0, 0], sizes = [8, 16], strides = [1, 1]} : vector<8x48xf32> to vector<8x16xf32>
    %140 = arith.addf %138, %139 : vector<8x16xf32>
    %141 = arith.negf %140 : vector<8x16xf32>
    %142 = math.exp %141 : vector<8x16xf32>
    %cst_56 = arith.constant 1.000000e+00 : f32
    %143 = vector.broadcast %cst_56 : f32 to vector<8x16xf32>
    %144 = arith.addf %143, %142 : vector<8x16xf32>
    %145 = arith.divf %143, %144 : vector<8x16xf32>
    %146 = vector.extract_strided_slice %134 {offsets = [0, 16], sizes = [8, 16], strides = [1, 1]} : vector<8x48xf32> to vector<8x16xf32>
    %147 = vector.extract_strided_slice %137 {offsets = [0, 16], sizes = [8, 16], strides = [1, 1]} : vector<8x48xf32> to vector<8x16xf32>
    %148 = arith.addf %146, %147 : vector<8x16xf32>
    %149 = arith.negf %148 : vector<8x16xf32>
    %150 = math.exp %149 : vector<8x16xf32>
    %cst_57 = arith.constant 1.000000e+00 : f32
    %151 = vector.broadcast %cst_57 : f32 to vector<8x16xf32>
    %152 = arith.addf %151, %150 : vector<8x16xf32>
    %153 = arith.divf %151, %152 : vector<8x16xf32>
    %154 = vector.extract_strided_slice %134 {offsets = [0, 32], sizes = [8, 16], strides = [1, 1]} : vector<8x48xf32> to vector<8x16xf32>
    %155 = vector.extract_strided_slice %137 {offsets = [0, 32], sizes = [8, 16], strides = [1, 1]} : vector<8x48xf32> to vector<8x16xf32>
    %156 = arith.mulf %145, %155 : vector<8x16xf32>
    %157 = arith.addf %154, %156 : vector<8x16xf32>
    %158 = math.tanh %157 : vector<8x16xf32>
    %cst_58 = arith.constant 1.000000e+00 : f32
    %159 = vector.broadcast %cst_58 : f32 to vector<8x16xf32>
    %160 = arith.subf %159, %153 : vector<8x16xf32>
    %161 = arith.mulf %160, %158 : vector<8x16xf32>
    %162 = arith.mulf %153, %127 : vector<8x16xf32>
    %163 = arith.addf %161, %162 : vector<8x16xf32>
    %164 = vector.broadcast %131 : i32 to vector<8x1xi32>
    %165 = arith.cmpi slt, %164, %20 : vector<8x1xi32>
    %cst_59 = arith.constant 0.000000e+00 : f32
    %166 = vector.shape_cast %165 : vector<8x1xi1> to vector<8x1xi1>
    %167 = vector.broadcast %166 : vector<8x1xi1> to vector<8x16xi1>
    %168 = vector.broadcast %cst_59 : f32 to vector<8x16xf32>
    %169 = arith.select %167, %163, %168 : vector<8x16xi1>, vector<8x16xf32>
    %cst_60 = arith.constant dense<0.000000e+00> : vector<8x8xf32>
    %170 = tpu.matmul %169, %19, %cst_60 {dimension_numbers = #tpu.dot_dimension_numbers<[1], [0], [0], [1], [0, 0, 1, 1], [], []>} : vector<8x16xf32>, vector<16x8xf32>, vector<8x8xf32> -> vector<8x8xf32>
    %171 = arith.index_cast %130 : i32 to index
    %c0_61 = arith.constant 0 : index
    %c0_62 = arith.constant 0 : index
    %172 = vector.load %arg12[%171, %c0_61, %c0_62] : memref<4x8x8xf32, #tpu.memory_space<vmem>>, vector<1x8x8xf32>
    %173 = vector.shape_cast %172 : vector<1x8x8xf32> to vector<8x8xf32>
    %174 = vector.shape_cast %170 : vector<8x8xf32> to vector<1x8x8xf32>
    tpu.vector_store %arg12[%171, %c0_61, %c0_62], %174 {strides = array<i32>} : memref<4x8x8xf32, #tpu.memory_space<vmem>>, vector<1x8x8xf32>,
    %175 = vector.shape_cast %165 : vector<8x1xi1> to vector<8x1xi1>
    %176 = vector.broadcast %175 : vector<8x1xi1> to vector<8x16xi1>
    %177 = arith.select %176, %163, %127 : vector<8x16xi1>, vector<8x16xf32>
    %c3_i32_63 = arith.constant 3 : i32
    %c0_i32_64 = arith.constant 0 : i32
    %178 = arith.cmpi eq, %arg0, %c0_i32_64 : i32
    %c3_i32_65 = arith.constant 3 : i32
    %179 = arith.subi %c3_i32_65, %c3_i32_63 : i32
    %180 = arith.select %178, %c3_i32_63, %179 : i32
    %181 = arith.addi %26, %180 : i32
    %182 = arith.index_cast %180 : i32 to index
    %c0_66 = arith.constant 0 : index
    %c0_67 = arith.constant 0 : index
    %183 = vector.load %arg11[%182, %c0_66, %c0_67] : memref<4x8x48xf32, #tpu.memory_space<vmem>>, vector<1x8x48xf32>
    %184 = vector.shape_cast %183 : vector<1x8x48xf32> to vector<8x48xf32>
    %cst_68 = arith.constant dense<0.000000e+00> : vector<8x48xf32>
    %185 = tpu.matmul %177, %15, %cst_68 {dimension_numbers = #tpu.dot_dimension_numbers<[1], [0], [0], [1], [0, 0, 1, 1], [], []>} : vector<8x16xf32>, vector<16x48xf32>, vector<8x48xf32> -> vector<8x48xf32>
    %186 = vector.broadcast %17 : vector<1x48xf32> to vector<8x48xf32>
    %187 = arith.addf %185, %186 : vector<8x48xf32>
    %188 = vector.extract_strided_slice %184 {offsets = [0, 0], sizes = [8, 16], strides = [1, 1]} : vector<8x48xf32> to vector<8x16xf32>
    %189 = vector.extract_strided_slice %187 {offsets = [0, 0], sizes = [8, 16], strides = [1, 1]} : vector<8x48xf32> to vector<8x16xf32>
    %190 = arith.addf %188, %189 : vector<8x16xf32>
    %191 = arith.negf %190 : vector<8x16xf32>
    %192 = math.exp %191 : vector<8x16xf32>
    %cst_69 = arith.constant 1.000000e+00 : f32
    %193 = vector.broadcast %cst_69 : f32 to vector<8x16xf32>
    %194 = arith.addf %193, %192 : vector<8x16xf32>
    %195 = arith.divf %193, %194 : vector<8x16xf32>
    %196 = vector.extract_strided_slice %184 {offsets = [0, 16], sizes = [8, 16], strides = [1, 1]} : vector<8x48xf32> to vector<8x16xf32>
    %197 = vector.extract_strided_slice %187 {offsets = [0, 16], sizes = [8, 16], strides = [1, 1]} : vector<8x48xf32> to vector<8x16xf32>
    %198 = arith.addf %196, %197 : vector<8x16xf32>
    %199 = arith.negf %198 : vector<8x16xf32>
    %200 = math.exp %199 : vector<8x16xf32>
    %cst_70 = arith.constant 1.000000e+00 : f32
    %201 = vector.broadcast %cst_70 : f32 to vector<8x16xf32>
    %202 = arith.addf %201, %200 : vector<8x16xf32>
    %203 = arith.divf %201, %202 : vector<8x16xf32>
    %204 = vector.extract_strided_slice %184 {offsets = [0, 32], sizes = [8, 16], strides = [1, 1]} : vector<8x48xf32> to vector<8x16xf32>
    %205 = vector.extract_strided_slice %187 {offsets = [0, 32], sizes = [8, 16], strides = [1, 1]} : vector<8x48xf32> to vector<8x16xf32>
    %206 = arith.mulf %195, %205 : vector<8x16xf32>
    %207 = arith.addf %204, %206 : vector<8x16xf32>
    %208 = math.tanh %207 : vector<8x16xf32>
    %cst_71 = arith.constant 1.000000e+00 : f32
    %209 = vector.broadcast %cst_71 : f32 to vector<8x16xf32>
    %210 = arith.subf %209, %203 : vector<8x16xf32>
    %211 = arith.mulf %210, %208 : vector<8x16xf32>
    %212 = arith.mulf %203, %177 : vector<8x16xf32>
    %213 = arith.addf %211, %212 : vector<8x16xf32>
    %214 = vector.broadcast %181 : i32 to vector<8x1xi32>
    %215 = arith.cmpi slt, %214, %20 : vector<8x1xi32>
    %cst_72 = arith.constant 0.000000e+00 : f32
    %216 = vector.shape_cast %215 : vector<8x1xi1> to vector<8x1xi1>
    %217 = vector.broadcast %216 : vector<8x1xi1> to vector<8x16xi1>
    %218 = vector.broadcast %cst_72 : f32 to vector<8x16xf32>
    %219 = arith.select %217, %213, %218 : vector<8x16xi1>, vector<8x16xf32>
    %cst_73 = arith.constant dense<0.000000e+00> : vector<8x8xf32>
    %220 = tpu.matmul %219, %19, %cst_73 {dimension_numbers = #tpu.dot_dimension_numbers<[1], [0], [0], [1], [0, 0, 1, 1], [], []>} : vector<8x16xf32>, vector<16x8xf32>, vector<8x8xf32> -> vector<8x8xf32>
    %221 = arith.index_cast %180 : i32 to index
    %c0_74 = arith.constant 0 : index
    %c0_75 = arith.constant 0 : index
    %222 = vector.load %arg12[%221, %c0_74, %c0_75] : memref<4x8x8xf32, #tpu.memory_space<vmem>>, vector<1x8x8xf32>
    %223 = vector.shape_cast %222 : vector<1x8x8xf32> to vector<8x8xf32>
    %224 = vector.shape_cast %220 : vector<8x8xf32> to vector<1x8x8xf32>
    tpu.vector_store %arg12[%221, %c0_74, %c0_75], %224 {strides = array<i32>} : memref<4x8x8xf32, #tpu.memory_space<vmem>>, vector<1x8x8xf32>,
    %225 = vector.shape_cast %215 : vector<8x1xi1> to vector<8x1xi1>
    %226 = vector.broadcast %225 : vector<8x1xi1> to vector<8x16xi1>
    %227 = arith.select %226, %213, %177 : vector<8x16xi1>, vector<8x16xf32>
    %c4_i32_76 = arith.constant 4 : i32
    %c0_77 = arith.constant 0 : index
    %c0_78 = arith.constant 0 : index
    %228 = vector.load %arg10[%c0_77, %c0_78] : memref<8x16xf32, #tpu.memory_space<vmem>>, vector<8x16xf32>
    tpu.vector_store %arg10[%c0_77, %c0_78], %227 {strides = array<i32>} : memref<8x16xf32, #tpu.memory_space<vmem>>, vector<8x16xf32>,
    %c0_79 = arith.constant 0 : index
    %c0_80 = arith.constant 0 : index
    %c0_81 = arith.constant 0 : index
    %229 = vector.load %arg12[%c0_79, %c0_80, %c0_81] : memref<4x8x8xf32, #tpu.memory_space<vmem>>, vector<4x8x8xf32>
    %c0_82 = arith.constant 0 : index
    %c0_83 = arith.constant 0 : index
    %c0_84 = arith.constant 0 : index
    %c0_85 = arith.constant 0 : index
    %230 = vector.load %arg9[%c0_82, %c0_83, %c0_84, %c0_85] : memref<1x4x8x8xf32, #tpu.memory_space<vmem>>, vector<1x4x8x8xf32>
    %231 = vector.shape_cast %230 : vector<1x4x8x8xf32> to vector<4x8x8xf32>
    %232 = vector.shape_cast %229 : vector<4x8x8xf32> to vector<1x4x8x8xf32>
    tpu.vector_store %arg9[%c0_82, %c0_83, %c0_84, %c0_85], %232 {strides = array<i32>} : memref<1x4x8x8xf32, #tpu.memory_space<vmem>>, vector<1x4x8x8xf32>,
    return
  }
  func.func @transform_0(%arg0: i32, %arg1: i32) -> (i32, i32, i32) {
    %c1_i32 = arith.constant 1 : i32
    %0 = arith.subi %c1_i32, %arg1 : i32
    %1 = arith.muli %arg0, %0 : i32
    %c1_i32_0 = arith.constant 1 : i32
    %2 = arith.subi %c1_i32_0, %arg0 : i32
    %3 = arith.muli %2, %arg1 : i32
    %4 = arith.addi %1, %3 : i32
    %c0_i32 = arith.constant 0 : i32
    %c0_i32_1 = arith.constant 0 : i32
    %c0_i32_2 = arith.constant 0 : i32
    return %4, %c0_i32, %c0_i32_1 : i32, i32, i32
  }
  func.func @transform_1(%arg0: i32, %arg1: i32) -> (i32, i32) {
    %c0_i32 = arith.constant 0 : i32
    %c0_i32_0 = arith.constant 0 : i32
    %c0_i32_1 = arith.constant 0 : i32
    return %c0_i32, %c0_i32_0 : i32, i32
  }
  func.func @transform_2(%arg0: i32, %arg1: i32) -> (i32, i32, i32) {
    %c0_i32 = arith.constant 0 : i32
    %c0_i32_0 = arith.constant 0 : i32
    %c0_i32_1 = arith.constant 0 : i32
    return %arg0, %c0_i32, %c0_i32_0 : i32, i32, i32
  }
  func.func @transform_3(%arg0: i32, %arg1: i32) -> (i32, i32, i32) {
    %c0_i32 = arith.constant 0 : i32
    %c0_i32_0 = arith.constant 0 : i32
    %c0_i32_1 = arith.constant 0 : i32
    return %arg0, %c0_i32, %c0_i32_0 : i32, i32, i32
  }
  func.func @transform_4(%arg0: i32, %arg1: i32) -> (i32, i32, i32) {
    %c0_i32 = arith.constant 0 : i32
    %c0_i32_0 = arith.constant 0 : i32
    %c0_i32_1 = arith.constant 0 : i32
    return %arg0, %c0_i32, %c0_i32_0 : i32, i32, i32
  }
  func.func @transform_5(%arg0: i32, %arg1: i32) -> (i32, i32, i32) {
    %c0_i32 = arith.constant 0 : i32
    %c0_i32_0 = arith.constant 0 : i32
    %c0_i32_1 = arith.constant 0 : i32
    return %arg0, %c0_i32, %c0_i32_0 : i32, i32, i32
  }
  func.func @transform_6(%arg0: i32, %arg1: i32) -> (i32, i32, i32) {
    %c0_i32 = arith.constant 0 : i32
    %c0_i32_0 = arith.constant 0 : i32
    %c0_i32_1 = arith.constant 0 : i32
    return %arg0, %c0_i32, %c0_i32_0 : i32, i32, i32
  }
  func.func @transform_7(%arg0: i32, %arg1: i32) -> (i32, i32, i32, i32) {
    %c1_i32 = arith.constant 1 : i32
    %0 = arith.subi %c1_i32, %arg1 : i32
    %1 = arith.muli %arg0, %0 : i32
    %c1_i32_0 = arith.constant 1 : i32
    %2 = arith.subi %c1_i32_0, %arg0 : i32
    %3 = arith.muli %2, %arg1 : i32
    %4 = arith.addi %1, %3 : i32
    %c0_i32 = arith.constant 0 : i32
    %c0_i32_1 = arith.constant 0 : i32
    %c0_i32_2 = arith.constant 0 : i32
    return %arg0, %4, %c0_i32, %c0_i32_1 : i32, i32, i32, i32
  }
}

</mosaic_0001>

<bundles_post_ra>
// kernel: tpu_custom_call.1
= control target key start
LH: loop header
LB: loop body
LE: loop exit
PB: predicated region body
PF: predicated region fallthrough
CT: control target
= control target key end

     0   :  { %6 = vsyncpa [#allocation3], 0  ;;  %s499_s0 = inlined_call_operand.hbm [shape: f32[16,128], index: 0, kind: input, shape index: {}]   ;;  %s500_s1 = inlined_call_operand.hbm [shape: f32[16,128], index: 1, kind: output, shape index: {}]  }
   0x1   :  { %7 = vsyncpa [#allocation4], 0 }
   0x2   :  { %9 = vsyncpa [#allocation4 + $0x1], 0  ;;  %s358_s6 = smov 0   ;;  %s360_s7 = smov 0  }
   0x3   :  { %s362_s8 = smov 0   ;;  %s364_s9 = smov 0  }
   0x4 LB: > { %s379_s10 = sadd.s32 4294967295, %s344_s9   ;;  %s193_s11 = sadd.s32 4294967294, %s344_s9   ;;  %s344_s9 = sphi %s364_s9, %s517_s9   ;;  %s340_s8 = sphi %s362_s8, %s516_s8   ;;  %s336_s7 = sphi %s360_s7, %s515_s7   ;;  %s332_s6 = sphi %s358_s6, %s514_s6  }
   0x5   : > { %s383_s12 = sadd.s32 1, %s344_s9   ;;  %s22_s13 = sadd.s32 1, %s340_s8 }
   0x6   : > { %s19_s14 = ssub.s32 %s344_s9, %s383_s12  ;;  %p35_p0 = scmp.ne.s32.totalorder %s336_s7, %s332_s6 }
   0x7   : > { %p20_p1 = scmp.eq.s32.totalorder %s19_s14, 0  ;;  %p36_p2 = scmp.eq.s32.totalorder %s379_s10, 0 }
   0x8   : > { %p58_p3 = scmp.ne.s32.totalorder %s340_s8, %s336_s7  ;;  %p59_p4 = scmp.eq.s32.totalorder %s379_s10, 1 }
   0x9   : > { %s395_s15 = scalar_select %p20_p1, %s340_s8, %s22_s13  }
   0xa   : > { %p397_p5 = por %p59_p4, %p58_p3  ;;  %p65_p6 = scmp.eq.s32.totalorder %s193_s11, 1 }
   0xb   : > { %p194_p7 = scmp.ge.s32.totalorder %s344_s9, 1  ;;  %p402_p8 = por %p36_p2, %p35_p0 }
   0xc   : > { %s505_s16 = scalar_select %p397_p5, 1, 0 }
   0xd   : > { %s506_s17 = scalar_select %p402_p8, 1, 0 }
   0xe   : > { %p72_p9 = scmp.lt.s32.totalorder %s344_s9, 3  ;;  %p407_p10 = por %p65_p6, %p35_p0 }
   0xf   : > { %s195_s19 = sshll.u32 %s379_s10, 7  ;;  %s346_s21 = smov [#allocation2]  }
  0x10   : > { %s507_s18 = scalar_select %p407_p10, 1, 0 }
  0x11   : > { %p412_p11 = pnand %p194_p7, %p72_p9  ;;  %s87_s22 = sshll.u32 %s346_s21, 4  ;;  %s88_s22 = int_to_ptr.vmem [resolvable:$true] %s87_s22 }
  0x12   : > { %s85_s25 = scalar_lea.hbm %s499_s0, %s195_s19  ;;  %s253_s30 = scalar_lea.hbm %s499_s0, 256 }
  0x13   : > { %s508_s20 = scalar_select %p412_p11, 1, 0 }
  0x14   : > { %p206_p12 = pneg %p412_p11  ;;  %s248_s27 = scalar_lea.hbm %s85_s25, 128 }
  0x15   : > { %p249_p0 = scmp.ne.s32.totalorder %s85_s25, %s248_s27  ;;  %p254_p4 = scmp.lt.u32.totalorder %s85_s25, %s499_s0 }
  0x16   : > { %p425_p13 = pnand %p206_p12, %p402_p8  ;;  %p255_p6 = scmp.lt.u32.totalorder %s253_s30, %s248_s27 }
  0x17   : > { %p257_p9 = scmp.lt.u32.totalorder %s248_s27, %s85_s25 }
  0x18   : > { %p250_p1 = pneg %p425_p13  ;;  %p256_p7 = por %p255_p6, %p254_p4 }
  0x1a   : > { %p251_p2 = pnand %p250_p1, %p249_p0  ;;  %p258_p12 = por %p257_p9, %p256_p7 }
  0x1c   : > { %p252_p3 = pneg %p251_p2 }
  0x1e   : > { %p259_p10 = pnand %p258_p12, %p252_p3 }
  0x20   : > { %262 = shalt.err (!%p259_p10)
}
  0x21   : > { %s263_s4 = scalar_lea.vmem %s88_s22, 128  ;;  %p271_p8 = scmp.lt.s32.totalorder %s88_s22, %s88_s22 }
  0x22   : > { %p264_p5 = scmp.ne.s32.totalorder %s88_s22, %s263_s4  ;;  %p272_p11 = scmp.lt.s32.totalorder %s263_s4, %s263_s4 }
  0x24   : > { %p266_p0 = pnand %p264_p5, %p250_p1  ;;  %p273_p4 = por %p272_p11, %p271_p8 }
  0x26   : > { %p267_p2 = pneg %p266_p0 }
  0x28   : > { %p274_p6 = pnand %p273_p4, %p267_p2 }
  0x2a   : > { %277 = shalt.err (!%p274_p6)
}
  0x2b   : > { %209 = dma.hbm_to_vmem [thread:$0]  (!%p425_p13), %s85_s25, 128, %s88_s22, [#allocation3]  }
  0x2c   : > { %p510_p7 = scmp.ne.s32.totalorder %s508_s20, 0 }
  0x2d   : > { %p511_p10 = scmp.ne.s32.totalorder (!%p510_p7), %s506_s17, 0 }
  0x2e   : > { %100 = sbr.rel (%p510_p7) target bundleno = 80 (0x50), region = 24 }
  0x35   : > { %323 = dma.done.wait (%p511_p10), [#allocation3], 128  }
  0x36   : > { %325 = vsyncadd (%p511_p10), [#allocation3], 4294967168  ;;  %s112_s5 = sand.u32 1, %s336_s7   ;;  %v115_v0 = vld [vmem:[#allocation2] sm:$0xff]  ;;  %s457_s20 = scalar_lea.hbm %s500_s1, %s195_s19 }
  0x37   : > { %s197_s11 = sshll.u32 %s112_s5, 3  ;;  %v116_v1 = vadd.f32 1.0, %v115_v0  ;;  %s119_s17 = scalar_lea.sflag [#allocation4], %s112_s5 }
  0x38   : > { %s114_s13 = scalar_lea.vmem [#allocation5], %s197_s11  ;;  %p512_p8 = scmp.ne.s32.totalorder %s505_s16, 0 }
  0x39   : > { %s132_s14 = sshll.u32 %s114_s13, 4  ;;  %117 = vst [vmem:[%s114_s13] sm:$0xff] %v116_v1  ;;  %s347_s24 = smov [#allocation5]   ;;  %s459_s14 = int_to_ptr.vmem [resolvable:$true] %s132_s14 }
  0x3a   : > { %s278_s23 = scalar_lea.vmem %s459_s14, 128  ;;  %s282_s10 = sshll.u32 %s347_s24, 4  ;;  %s283_s10 = int_to_ptr.vmem [resolvable:$false] %s282_s10 }
  0x3b   : > { %p279_p5 = scmp.ne.s32.totalorder %s459_s14, %s278_s23  ;;  %s284_s25 = scalar_lea.vmem %s283_s10, 256 }
  0x3c   : > { %p285_p1 = scmp.lt.s32.totalorder %s459_s14, %s283_s10  ;;  %p286_p3 = scmp.lt.s32.totalorder %s284_s25, %s278_s23 }
  0x3d   : > { %p280_p11 = pnand %p279_p5, %p512_p8 }
  0x3e   : > { %p287_p9 = por %p286_p3, %p285_p1 }
  0x3f   : > { %p281_p13 = pneg %p280_p11 }
  0x41   : > { %p288_p12 = pnand %p287_p9, %p281_p13 }
  0x43   : > { %291 = shalt.err (!%p288_p12)
}
  0x44   : > { %s292_s19 = scalar_lea.hbm %s457_s20, 128  ;;  %s296_s28 = scalar_lea.hbm %s500_s1, 256 }
  0x45   : > { %p293_p0 = scmp.ne.s32.totalorder %s457_s20, %s292_s19  ;;  %p297_p6 = scmp.lt.u32.totalorder %s457_s20, %s500_s1 }
  0x46   : > { %p298_p7 = scmp.lt.u32.totalorder %s296_s28, %s292_s19  ;;  %p300_p5 = scmp.lt.u32.totalorder %s292_s19, %s457_s20 }
  0x47   : > { %p294_p2 = pnand %p293_p0, %p512_p8 }
  0x48   : > { %p299_p10 = por %p298_p7, %p297_p6 }
  0x49   : > { %p295_p4 = pneg %p294_p2 }
  0x4a   : > { %p301_p11 = por %p300_p5, %p299_p10 }
  0x4c   : > { %p302_p13 = pnand %p301_p11, %p295_p4 }
  0x4e   : > { %305 = shalt.err (!%p302_p13)
}
  0x4f   : > { %204 = dma.vmem_to_hbm [thread:$0]  (%p512_p8), %s459_s14, 128, %s457_s20, %s119_s17  }
  0x50 PF: > { %p214_p1 = scmp.ge.s32.totalorder %s344_s9, 2  ;;  %s144_s2 = sand.u32 1, %s332_s6  }
  0x51   : > { %p513_p3 = scmp.ne.s32.totalorder %s507_s18, 0  ;;  %s145_s3 = scalar_lea.sflag [#allocation4], %s144_s2 }
  0x53   : > { %p211_p9 = pnand %p214_p1, %p513_p3 }
  0x55   : > { %327 = dma.done.wait (!%p211_p9), %s145_s3, 128  }
  0x56   : > { %329 = vsyncadd (!%p211_p9), %s145_s3, 4294967168  ;;  %p12_p12 = scmp.ge.s32.totalorder %s383_s12, 4   ;;  %s514_s6 = smov %s336_s7 }
  0x57   : > { %s515_s7 = smov %s340_s8  ;;  %s516_s8 = smov %s395_s15 }
  0x58   : > { %s517_s9 = smov %s383_s12  ;;  %14 = sbr.rel (!%p12_p12) target bundleno = 4 (0x4), region = 62 }
  0x5f   :  { %150 = vsyncpa [#allocation3], 1 }
  0x60   :  { %152 = vsyncpa [#allocation3 + $0x1], 1 }
  0x61   :  { %153 = vsyncpa [#allocation4], 1 }
  0x62   :  { %155 = vsyncpa [#allocation4 + $0x1], 1 }

// kernel: tpu_custom_call.1
= control target key start
LH: loop header
LB: loop body
LE: loop exit
PB: predicated region body
PF: predicated region fallthrough
CT: control target
= control target key end

     0   :  { %s2516_s0 = inlined_call_operand.hbm [shape: f32[8,8,16], index: 0, kind: input, shape index: {}]   ;;  %s2517_s1 = inlined_call_operand.vmem [shape: s32[8,1], index: 1, kind: input, shape index: {}]   ;;  %s2518_s2 = inlined_call_operand.vmem [shape: f32[2,16,48], index: 2, kind: input, shape index: {}]   ;;  %s2519_s3 = inlined_call_operand.vmem [shape: f32[2,16,48], index: 3, kind: input, shape index: {}]   ;;  %s2520_s4 = inlined_call_operand.vmem [shape: f32[2,1,48], index: 4, kind: input, shape index: {}]   ;;  %s2521_s5 = inlined_call_operand.vmem [shape: f32[2,1,48], index: 5, kind: input, shape index: {}]   ;;  %s2522_s6 = inlined_call_operand.vmem [shape: f32[2,16,8], index: 6, kind: input, shape index: {}]   ;;  %s2523_s7 = inlined_call_operand.hbm [shape: f32[2,8,8,8], index: 7, kind: output, shape index: {}]  }
   0x1   :  { %2538 = sst [smem:[#allocation23_spill]] %s2516_s0 }
   0x2   :  { %12 = vsyncpa [#allocation6], 0 }
   0x3   :  { %14 = vsyncpa [#allocation6 + $0x1], 0 }
   0x4   :  { %15 = vsyncpa [#allocation7], 0 }
   0x5   :  { %17 = vsyncpa [#allocation7 + $0x1], 0  ;;  %s2065_s24 = smov 0   ;;  %s2067_s25 = smov 0  }
   0x6   :  { %s2069_s26 = smov 0   ;;  %s2071_s27 = smov 0  }
   0x7   :  { %s2073_s28 = smov 0   ;;  %s2075_s29 = smov 0  }
   0x8   :  { %s2077_s30 = smov 0   ;;  %s2079_s8 = smov 0  }
   0x9   :  { %s2081_s9 = smov 0   ;;  %s2083_s10 = smov 0  }
   0xa   :  { %s2085_s11 = smov 0  }
   0xb LB: > { %2539 = sst [smem:[#allocation11_spill]] %s1968_s24  ;;  %s2526_s12 = sadd.s32 4294967295, %s2008_s11   ;;  %s2008_s11 = sphi %s2085_s11, %s23_s11   ;;  %s2004_s10 = sphi %s2083_s10, %s2574_s10   ;;  %s2000_s9 = sphi %s2081_s9, %s2573_s9   ;;  %s1996_s8 = sphi %s2079_s8, %s2572_s8   ;;  %s1992_s30 = sphi %s2077_s30, %s2571_s30   ;;  %s1988_s29 = sphi %s2075_s29, %s2577_s29   ;;  %s1984_s28 = sphi %s2073_s28, %s2569_s28   ;;  %s1980_s27 = sphi %s2071_s27, %s2568_s27   ;;  %s1976_s26 = sphi %s2069_s26, %s2567_s26   ;;  %s1972_s25 = sphi %s2067_s25, %s2576_s25   ;;  %s1968_s24 = sphi %s2065_s24, %s2575_s24  }
   0xc   : > { %2540 = sst [smem:[#allocation12_spill]] %s1976_s26  ;;  %s32_s14 = sadd.s32 1, %s2000_s9 }
   0xd   : > { %2541 = sst [smem:[#allocation13_spill]] %s1984_s28  ;;  %s35_s15 = sadd.s32 1, %s2004_s10 }
   0xe   : > { %2542 = sst [smem:[#allocation14_spill]] %s1988_s29  ;;  %p33_p0 = scmp.ge.s32.totalorder %s32_s14, 2 }
   0xf   : > { %2543 = sst [smem:[#allocation15_spill]] %s2000_s9  ;;  %s39_s16 = ssub.s32 1, %s2000_s9 }
  0x10   : > { %2544 = sst [smem:[#allocation16_spill]] %s2004_s10  ;;  %s40_s17 = smul.u32 %s2004_s10, %s39_s16 }
  0x11   : > { %2545 = sst [smem:[#allocation17_spill]] %s2008_s11  ;;  %s41_s18 = ssub.s32 1, %s2004_s10 }
  0x12   : > { %s2579_s14 = smov (%p33_p0, %s32_s14), 0  ;;  %s2581_s15 = smov (!%p33_p0, %s35_s15), %s2004_s10 }
  0x13   : > { %2546 = sst [smem:[#allocation18_spill]] %s2579_s14  ;;  %s42_s19 = smul.u32 %s2000_s9, %s41_s18 }
  0x14   : > { %s44_s20 = ssub.s32 1, %s2579_s14  ;;  %p37_p1 = scmp.ge.s32.totalorder %s2581_s15, 2 }
  0x15   : > { %s52_s21 = sadd.s32 1, %s1988_s29  ;;  %s2133_s22 = sadd.s32 %s42_s19, %s40_s17 }
  0x16   : > { %p59_p2 = scmp.ne.s32.totalorder %s1988_s29, %s1984_s28  ;;  %s2583_s15 = smov (%p37_p1, %s2581_s15), 0 }
  0x17   : > { %2547 = sst [smem:[#allocation19_spill]] %s2583_s15  ;;  %p60_p3 = scmp.eq.s32.totalorder %s2008_s11, 0 }
  0x18   : > { %p65_p4 = scmp.ne.s32.totalorder %s1984_s28, %s1980_s27  ;;  %s45_s23 = smul.u32 %s44_s20, %s2583_s15 }
  0x19   : > { %s46_s16 = ssub.s32 1, %s2583_s15  ;;  %p2145_p5 = por %p60_p3, %p59_p2 }
  0x1a   : > { %s47_s17 = smul.u32 %s46_s16, %s2579_s14  ;;  %p66_p6 = scmp.eq.s32.totalorder %s2526_s12, 0 }
  0x1b   : > { %s236_s19 = ssub.s32 %s2004_s10, %s2583_s15  ;;  %s241_s9 = sadd.s32 1, %s1976_s26 }
  0x1c   : > { %s48_s13 = sadd.s32 %s47_s17, %s45_s23  ;;  %p2155_p7 = por %p66_p6, %p65_p4 }
  0x1d   : > { %s49_s27 = ssub.s32 %s2133_s22, %s48_s13  ;;  %p251_p10 = scmp.ne.s32.totalorder %s1976_s26, %s1972_s25 }
  0x1e   : > { %p50_p8 = scmp.eq.s32.totalorder %s49_s27, 0  ;;  %s238_s16 = sor.u32 %s236_s19, %s49_s27 }
  0x1f   : > { %p239_p9 = scmp.eq.s32.totalorder %s238_s16, 0  ;;  %s2552_s15 = sadd.s32 4294967295, %s2008_s11  }
  0x20   : > { %s2162_s14 = scalar_select %p50_p8, %s1988_s29, %s52_s21  }
  0x21   : > { %s2165_s12 = scalar_select %p239_p9, %s1976_s26, %s241_s9  }
  0x22   : > { %2550 = sst [smem:[#allocation20_spill]] %s2162_s14  ;;  %p252_p11 = scmp.eq.s32.totalorder %s2552_s15, 3 }
  0x23   : > { %2551 = sst [smem:[#allocation21_spill]] %s2165_s12  ;;  %p257_p12 = scmp.ne.s32.totalorder %s1972_s25, %s1968_s24 }
  0x24   : > { %s2553_s23 = sadd.s32 4294967294, %s2008_s11   ;;  %p2173_p0 = por %p252_p11, %p251_p10 }
  0x25   : > { %p258_p13 = scmp.eq.s32.totalorder %s2553_s23, 3  ;;  %p1727_p1 = scmp.lt.s32.totalorder %s2008_s11, 4 }
  0x26   : > { %s2554_s13 = scalar_select %p2173_p0, 1, 0 }
  0x27   : > { %p2178_p2 = por %p258_p13, %p257_p12  ;;  %s281_s19 = sand.u32 1, %s1988_s29  }
  0x28   : > { %s1545_s21 = sshll.u32 %s281_s19, 5  ;;  %s1587_s27 = sshll.u32 %s2133_s22, 9 }
  0x29   : > { %s2555_s17 = scalar_select %p2178_p2, 1, 0 }
  0x2a   : > { %s2557_s0 = sld [smem:[#allocation23_spill]]  ;;  %s285_s15 = scalar_lea.vmem [#allocation5], %s1545_s21 }
  0x2b   : > { %2556 = sst [smem:[#allocation22_spill]] %s2555_s17  ;;  %s297_s23 = sshll.u32 %s285_s15, 4  ;;  %s2189_s23 = int_to_ptr.vmem [resolvable:$true] %s297_s23 }
  0x2c   : > { %p2193_p3 = pnand %p1727_p1, %p2145_p5  ;;  %s2198_s22 = scalar_lea.sflag [#allocation6], %s281_s19 }
  0x2e   : > { %p1858_p8 = pneg %p2193_p3 }
  0x30   : > { %s2187_s10 = scalar_lea.hbm %s2557_s0, %s1587_s27  ;;  %s1861_s18 = scalar_lea.hbm %s2557_s0, 1024 }
  0x31   : > { %s1856_s27 = scalar_lea.hbm %s2187_s10, 512  ;;  %p1862_p5 = scmp.lt.u32.totalorder %s2187_s10, %s2557_s0 }
  0x32   : > { %p1857_p6 = scmp.ne.s32.totalorder %s2187_s10, %s1856_s27  ;;  %p1863_p11 = scmp.lt.u32.totalorder %s1861_s18, %s1856_s27 }
  0x33   : > { %p1865_p13 = scmp.lt.u32.totalorder %s1856_s27, %s2187_s10 }
  0x34   : > { %p1859_p9 = pnand %p1858_p8, %p1857_p6  ;;  %p1864_p12 = por %p1863_p11, %p1862_p5 }
  0x36   : > { %p1860_p10 = pneg %p1859_p9  ;;  %p1866_p1 = por %p1865_p13, %p1864_p12 }
  0x38   : > { %p1867_p4 = pnand %p1866_p1, %p1860_p10 }
  0x3a   : > { %1870 = shalt.err (!%p1867_p4)
}
  0x3b   : > { %s1871_s19 = scalar_lea.vmem %s2189_s23, 512  ;;  %s2010_s21 = smov [#allocation5]  }
  0x3c   : > { %p1872_p6 = scmp.ne.s32.totalorder %s2189_s23, %s1871_s19  ;;  %s1876_s16 = sshll.u32 %s2010_s21, 4  ;;  %s1877_s16 = int_to_ptr.vmem [resolvable:$false] %s1876_s16 }
  0x3d   : > { %s1878_s9 = scalar_lea.vmem %s1877_s16, 1024  ;;  %p1879_p0 = scmp.lt.s32.totalorder %s2189_s23, %s1877_s16 }
  0x3e   : > { %p1874_p9 = pnand %p1872_p6, %p1858_p8  ;;  %p1880_p5 = scmp.lt.s32.totalorder %s1878_s9, %s1871_s19 }
  0x40   : > { %p1875_p2 = pneg %p1874_p9  ;;  %p1881_p11 = por %p1880_p5, %p1879_p0 }
  0x42   : > { %p1882_p12 = pnand %p1881_p11, %p1875_p2 }
  0x44   : > { %1885 = shalt.err (!%p1882_p12)
}
  0x45   : > { %s2011_s27 = smov 128   ;;  %s2012_s18 = smov 8  }
  0x46   : > { %1722 = dma.hbm_to_vmem [thread:$0]  (!%p2193_p3), %s2187_s10, 512, %s2189_s23, %s2198_s22, %s2011_s27, %s2011_s27, %s2012_s18  }
  0x47   : > { %p341_p4 = scmp.lt.s32.totalorder %s2008_s11, 5  ;;  %p2559_p8 = scmp.ge.s32.totalorder %s2008_s11, 1 }
  0x49   : > { %p342_p10 = pnand %p2559_p8, %p341_p4 }
  0x4a   : > { %s347_s15 = sand.u32 (!%p342_p10), 1, %s1984_s28  }
  0x4b   : > { %345 = sbr.rel (%p342_p10) target bundleno = 3111 (0xc27), region = 48  ;;  %s1549_s19 = sshll.u32 (!%p342_p10), %s347_s15, 5 }
  0x4c   : > { %s348_s21 = scalar_lea.sflag (!%p342_p10), [#allocation6], %s347_s15  ;;  %s2230_s16 = scalar_lea.vmem (!%p342_p10), [#allocation5], %s1549_s19 }
  0x52   : > { %1959 = dma.done.wait (%p2155_p7), %s348_s21, 512  }
  0x53   : > { %1961 = vsyncadd (%p2155_p7), %s348_s21, 4294966784  ;;  %s2532_s10 = sand.u32 1, %s1972_s25   ;;  %p409_p0 = scmp.lt.s32.totalorder %s1996_s8, 1 }
  0x54   : > { %s1550_s14 = sshll.u32 %s2532_s10, 5  ;;  %p1557_p7 = scmp.ne.s32.totalorder %s1992_s30, 0 }
  0x55   : > { %s2241_s23 = scalar_select %p409_p0, %s1996_s8, 1 }
  0x56   : > { %s2263_s11 = scalar_lea.vmem [#allocation8], %s1550_s14  ;;  %439 = sbr.rel (%p1557_p7) target bundleno = 93 (0x5d), region = 56  ;;  %vm440_vm0 = vcmask (!%p1557_p7), 130048   ;;  %v2013_v0 = vmov (!%p1557_p7), 0.0  }
  0x57   : > { %s1588_s22 = sshll.u32 %s2241_s23, 4  ;;  %s421_s18 = scalar_lea.vmem %s2520_s4, %s2241_s23  ;;  %441 = vst.msk [vmem:[#allocation2] sm:$0xff] (!%p1557_p7), %vm440_vm0, %v2013_v0 }
  0x58   : > { %s413_s19 = scalar_lea.vmem %s2518_s2, %s1588_s22  ;;  %s418_s29 = scalar_lea.vmem %s2519_s3, %s1588_s22 }
  0x59   : > { %s424_s12 = scalar_lea.vmem %s2521_s5, %s2241_s23  ;;  %s2261_s24 = scalar_lea.vmem %s2522_s6, %s1588_s22 }
  0x5d PF: > { %v446_v1 = vld [vmem:[%s413_s19] sm:$0xff]  ;;  %v447_v2 = vld [vmem:[%s413_s19 + $0x8] sm:$0xff]  ;;  %v2014_v4 = vmov 0.0|0.0   ;;  %vm2015_vm1 = vmmov 0   ;;  %v2016_v7 = vmov 0.0   ;;  %vm455_vm2 = vcmask 130048  }
  0x5e   : > { %v558_v3 = vld [vmem:[%s418_s29] sm:$0xff]  ;;  %1691 = vmatprep.subr.bf16.mxu1 %v2014_v4  ;;  %v1687_v5 = vpack.c.bf16 %v447_v2, %v446_v1  ;;  %v559_v6 = vld [vmem:[%s418_s29 + $0x8] sm:$0xff]  ;;  %1635 = vmatprep.mubr.msk.f32.mxu1 %vm2015_vm1, %v2016_v7  ;;  %v443_v11 = vld [vmem:[%s2230_s16 + $0x8] sm:$0xff]  ;;  %p571_p2 = scmp.eq.s32.totalorder %s1996_s8, 0  ;;  %s564_s0 = ssub.s32 1, %s1992_s30  ;;  %v2017_v14 = vmov 0  }
  0x5f   : > { %v442_v8 = vld [vmem:[%s2230_s16] sm:$0xff]  ;;  %v2270_v9 = vpack.c.bf16 %v559_v6, %v558_v3  ;;  %v2274_v10 = vld [vmem:[#allocation2] sm:$0xff]  ;;  %v444_v12 = vld [vmem:[%s2230_s16 + $0x10] sm:$0xff]  ;;  %s566_s26 = ssub.s32 1, %s1996_s8  ;;  %1830 = vset.pattern.permute.xlu1 %v2017_v14  ;;  %s565_s28 = smul.u32 %s1996_s8, %s564_s0  ;;  %1831 = vset.pattern.permute.xlu0 %v2017_v14  ;;  %vm553_vm3 = vcmask 392192   ;;  %vm769_vm11 = vcmask 64512  }
  0x60   : > { %1625 = vmatprep.mubr.msk.f32.mxu0 %vm455_vm2, %v442_v8  ;;  %1688 = vmatprep.subr.bf16.mxu0 %v1687_v5  ;;  %v445_v13 = vld [vmem:[%s2230_s16 + $0x18] sm:$0xff]  ;;  %s567_s16 = smul.u32 %s1992_s30, %s566_s26  ;;  %s2019_s19 = smov 32  }
  0x61   : > { %1693 = vmatpush3.bf16.msra.mxu1 %v2270_v9  ;;  %1690 = vmatpush3.bf16.msra.mxu0 %v1687_v5  ;;  %v2303_v15 = vld [vmem:[%s424_s12] ss:$0 sm:$0xff]  ;;  %s2313_s22 = scalar_select %p571_p2, 0, 3 }
  0x62   : > { %1697 = vmatprep.subr.bf16.mxu0 %v2014_v4  ;;  %1694 = vmatprep.subr.bf16.mxu1 %v2014_v4  ;;  %v1558_v16 = vld [vmem:[%s421_s18] ss:$0 sm:$0xff]  ;;  %s568_s9 = sadd.s32 %s567_s16, %s565_s28  ;;  %s2018_s18 = smov 96  }
  0x63   : > { %v2319_v23 = vld [vmem:[%s2517_s1] sm:$0xff]  ;;  %s2321_s23 = sshll.u32 %s568_s9, 2  ;;  %s1564_s20 = sshll.u32 %s2313_s22, 3 }
  0x64   : > { %1636 = vmatmul.mubr.msk.f32.vlgmr.msra.gmra.mrb[0].mxu1 %vm455_vm2, %v2274_v10  ;;  %1626 = vmatmul.mubr.msk.f32.vlgmr.msra.gmra.mrb[0].mxu0 %vm455_vm2, %v443_v11  ;;  %s573_s27 = sadd.s32 %s2321_s23, %s2313_s22  ;;  %s575_s15 = scalar_lea.vmem [#allocation3], %s1564_s20 }
  0x65   : > { %1628 = vmatprep.mubr.msk.f32.mxu0 %vm455_vm2, %v444_v12  ;;  %1699 = vmatpush3.bf16.msra.mxu0 %v2270_v9  ;;  %v685_v25 = vstv %s573_s27  ;;  %s2020_s21 = smov 16   ;;  %s2021_s0 = smov 112  }
  0x66   : > { %1703 = vmatprep.subr.bf16.mxu0 %v2014_v4  ;;  %1642 = vmatprep.mubr.msk.f32.mxu1 %vm2015_vm1, %v2016_v7  ;;  %vm686_vm4 = vcmp.lt.s32.totalorder %v685_v25, %v2319_v23  ;;  %s2350_s26 = scalar_select %p571_p2, 1, 2 }
  0x67   : > { %v687_v29 = vsel %vm686_vm4, 1, %v2017_v14  ;;  %s2370_s16 = scalar_select %p571_p2, 2, 1 }
  0x68   : > { %1629 = vmatmul.mubr.msk.f32.gmra.mrb[2].mxu0 %vm455_vm2, %v445_v13  ;;  %689 = vperm.xlu1 %1830, %v687_v29   ;;  %s1569_s28 = sshll.u32 %s2350_s26, 3  ;;  %s773_s17 = sadd.s32 %s2321_s23, %s2350_s26 }
  0x69   : > { %1649 = vmatprep.mubr.msk.f32.mxu0 %vm2015_vm1, %v2016_v7  ;;  %s775_s29 = scalar_lea.vmem [#allocation3], %s1569_s28  ;;  %v878_v60 = vstv %s773_s17  ;;  %s965_s10 = sadd.s32 %s2321_s23, %s2370_s16 }
  0x6a   : > { %vm879_vm6 = vcmp.lt.s32.totalorder %v878_v60, %v2319_v23  ;;  %s1573_s14 = sshll.u32 %s2370_s16, 3  ;;  %s961_s22 = scalar_lea.vmem [#allocation4], %s1569_s28 }
  0x6b   : > { %v880_v61 = vsel %vm879_vm6, 1, %v2017_v14  ;;  %s967_s9 = scalar_lea.vmem [#allocation3], %s1573_s14  ;;  %s1382_s26 = sshll.u32 %s2263_s11, 4  ;;  %s2447_s26 = int_to_ptr.vmem [resolvable:$true] %s1382_s26 }
  0x6c   : > { %s2387_s12 = scalar_select %p571_p2, 3, 0 }
  0x6d   : > { %s1886_s16 = scalar_lea.vmem %s2447_s26, 512  ;;  %p2561_p13 = scmp.ne.s32.totalorder %s2554_s13, 0 }
  0x6e   : > { %s1157_s30 = sadd.s32 %s2321_s23, %s2387_s12  ;;  %s1577_s27 = sshll.u32 %s2387_s12, 3 }
  0x6f   : > { %p1887_p3 = scmp.ne.s32.totalorder %s2447_s26, %s1886_s16 }
  0x71   : > { %p1888_p1 = pnand %p1887_p3, %p2561_p13 }
  0x73   : > { %p1889_p6 = pneg %p1888_p1 }
  0xe7   : > { %v690_v42 = vpop.permute.xlu1 %689 }
  0xe8   : > { %vm691_vm5 = vcmp.eq.s32.totalorder %v690_v42, 1 }
 0x137   : > { %v652_v17 = vpop.f32.mrb[0].mxu1  ;;  %v1627_v18 = vpop.f32.mrb[0].mxu0 }
 0x138   : > { %v653_v19 = vadd.f32 %v2303_v15, %v652_v17  ;;  %v1637_v20 = vpop.f32.mrb[1].mxu1  ;;  %v540_v21 = vadd.f32 %v1627_v18, %v1558_v16  ;;  %v534_v22 = vpop.f32.mrb[1].mxu0  ;;  %v1070_v18 = vstv %s965_s10  ;;  %s2022_s10 = smov [#allocation8]  }
 0x139   : > { %v535_v24 = vadd.f32 %v1558_v16, %v534_v22  ;;  %vm1071_vm8 = vcmp.lt.s32.totalorder %v1070_v18, %v2319_v23 }
 0x13a   : > { %664 = vrot.lane.b32.xlu0 %v653_v19, %s2018_s18  ;;  %555 = vst.msk [vmem:[#allocation3 + $0x8] sm:$0xff] %vm553_vm3, %v540_v21 }
 0x13b   : > { %554 = vst.msk [vmem:[#allocation3] sm:$0xff] %vm553_vm3, %v535_v24  ;;  %v1630_v26 = vpop.f32.mrb[2].mxu0 }
 0x13c   : > { %v550_v27 = vadd.f32 %v1630_v26, %v1558_v16  ;;  %v544_v28 = vpop.f32.mrb[3].mxu0 }
 0x13d   : > { %v545_v30 = vadd.f32 %v1558_v16, %v544_v28 }
 0x13e   : > { %557 = vst.msk [vmem:[#allocation3 + $0x18] sm:$0xff] %vm553_vm3, %v550_v27 }
 0x13f   : > { %556 = vst.msk [vmem:[#allocation3 + $0x10] sm:$0xff] %vm553_vm3, %v545_v30 }
 0x146   : > { %v576_v31 = vld [vmem:[%s575_s15] sm:$0xff]  ;;  %s1159_s15 = scalar_lea.vmem [#allocation3], %s1577_s27 }
 0x147   : > { %v656_v32 = vadd.f32 %v653_v19, %v576_v31  ;;  %v776_v55 = vld [vmem:[%s775_s29] sm:$0xff] }
 0x148   : > { %v968_v22 = vld [vmem:[%s967_s9] sm:$0xff] }
 0x149   : > { %v1567_v33 = vmul.f32 -1.442695, %v656_v32 }
 0x14b   : > { %1832 = vpow2.f32 %v1567_v33 }
 0x155   : > { %v1833_v34 = vpop.eup %1832 }
 0x156   : > { %v660_v35 = vadd.f32 1.0, %v1833_v34 }
 0x158   : > { %1834 = vrcp.f32 %v660_v35 }
 0x162   : > { %v1835_v36 = vpop.eup %1834 }
 0x163   : > { %v674_v44 = vsub.f32 1.0, %v1835_v36 }
 0x1ac   : > { %v665_v37 = vpop.permute.xlu0 %664 }
 0x1ad   : > { %v667_v38 = vmul.f32 %v1835_v36, %v665_v37 }
 0x1af   : > { %669 = vrot.lane.b32.xlu0 %v667_v38, %s2019_s19 }
 0x1b3   : > { %680 = vrot.lane.b32.xlu0 %v2274_v10, %s2020_s21  ;;  %s1345_s21 = scalar_lea.vmem [#allocation4], %s1577_s27 }
 0x221   : > { %v670_v39 = vpop.permute.xlu0 %669 }
 0x222   : > { %v672_v40 = vadd.f32 %v670_v39, %v576_v31 }
 0x224   : > { %1836 = vtanh.f32 %v672_v40 }
 0x225   : > { %v681_v43 = vpop.permute.xlu0 %680 }
 0x226   : > { %v683_v46 = vmul.f32 %v1835_v36, %v681_v43 }
 0x22e   : > { %v1837_v41 = vpop.eup %1836 }
 0x22f   : > { %676 = vrot.lane.b32.xlu1 %v1837_v41, %s2021_s0 }
 0x2a1   : > { %v677_v45 = vpop.permute.xlu1 %676 }
 0x2a2   : > { %v679_v47 = vmul.f32 %v677_v45, %v674_v44 }
 0x2a4   : > { %v684_v48 = vadd.f32 %v683_v46, %v679_v47 }
 0x2a6   : > { %v771_v49 = vsel %vm691_vm5, %v684_v48, %v681_v43  ;;  %v2338_v50 = vsel %vm691_vm5, %v684_v48, 0.0  ;;  %v1262_v43 = vstv %s1157_s30  ;;  %v561_v48 = vld [vmem:[%s2261_s24] sm:$0xff] }
 0x2a7   : > { %778 = vrot.lane.b32.xlu1 %v771_v49, %s2021_s0  ;;  %vm1263_vm10 = vcmp.lt.s32.totalorder %v1262_v43, %v2319_v23 }
 0x2a8   : > { %v1264_v47 = vsel %vm1263_vm10, 1, %v2017_v14 }
 0x319   : > { %v779_v51 = vpop.permute.xlu1 %778 }
 0x31a   : > { %1650 = vmatmul.mubr.msk.f32.vlgmr.msra.gmra.mrb[4].mxu0 %vm455_vm2, %v779_v51 }
 0x31b   : > { %1705 = vmatpush3.bf16.msra.mxu0 %v2270_v9  ;;  %1663 = vmatprep.mubr.msk.f32.mxu0 %vm2015_vm1, %v2016_v7 }
 0x31c   : > { %1709 = vmatprep.subr.bf16.mxu0 %v2014_v4 }
 0x3ed   : > { %v848_v52 = vpop.f32.mrb[4].mxu0 }
 0x3ee   : > { %v849_v53 = vadd.f32 %v2303_v15, %v848_v52  ;;  %v1651_v54 = vpop.f32.mrb[5].mxu0 }
 0x3f0   : > { %860 = vrot.lane.b32.xlu0 %v849_v53, %s2018_s18  ;;  %v852_v56 = vadd.f32 %v849_v53, %v776_v55 }
 0x3f2   : > { %v1571_v57 = vmul.f32 -1.442695, %v852_v56 }
 0x3f4   : > { %1838 = vpow2.f32 %v1571_v57  ;;  %882 = vperm.xlu0 %1831, %v880_v61  }
 0x3fe   : > { %v1839_v58 = vpop.eup %1838 }
 0x3ff   : > { %v856_v59 = vadd.f32 1.0, %v1839_v58 }
 0x401   : > { %1840 = vrcp.f32 %v856_v59 }
 0x40b   : > { %v1841_v62 = vpop.eup %1840 }
 0x40c   : > { %v870_v5 = vsub.f32 1.0, %v1841_v62  ;;  %v876_v10 = vmul.f32 %v1841_v62, %v771_v49 }
 0x462   : > { %v861_v63 = vpop.permute.xlu0 %860 }
 0x463   : > { %v863_v0 = vmul.f32 %v1841_v62, %v861_v63 }
 0x465   : > { %865 = vrot.lane.b32.xlu1 %v863_v0, %s2019_s19 }
 0x473   : > { %v883_v6 = vpop.permute.xlu0 %882 }
 0x474   : > { %vm884_vm7 = vcmp.eq.s32.totalorder %v883_v6, 1 }
 0x4d7   : > { %v866_v1 = vpop.permute.xlu1 %865 }
 0x4d8   : > { %v868_v2 = vadd.f32 %v866_v1, %v776_v55 }
 0x4da   : > { %1842 = vtanh.f32 %v868_v2 }
 0x4e4   : > { %v1843_v3 = vpop.eup %1842 }
 0x4e5   : > { %872 = vrot.lane.b32.xlu1 %v1843_v3, %s2021_s0 }
 0x557   : > { %v873_v8 = vpop.permute.xlu1 %872 }
 0x558   : > { %v875_v11 = vmul.f32 %v873_v8, %v870_v5 }
 0x55a   : > { %v877_v12 = vadd.f32 %v876_v10, %v875_v11 }
 0x55c   : > { %v2361_v13 = vsel %vm884_vm7, %v877_v12, 0.0  ;;  %v963_v16 = vsel %vm884_vm7, %v877_v12, %v771_v49  ;;  %v562_v49 = vld [vmem:[%s2261_s24 + $0x8] sm:$0xff]  ;;  %s768_s24 = scalar_lea.vmem [#allocation4], %s1564_s20  ;;  %s1583_s20 = sshll.u32 %s1996_s8, 3 }
 0x55d   : > { %970 = vrot.lane.b32.xlu1 %v963_v16, %s2021_s0  ;;  %v1695_v51 = vpack.c.bf16 %v562_v49, %v561_v48  ;;  %s2560_s8 = sand.u32 1, %s1972_s25  }
 0x55f   : > { %1696 = vmatpush3.bf16.msra.mxu1 %v1695_v51 }
 0x560   : > { %1700 = vmatprep.subr.bf16.mxu1 %v2014_v4 }
 0x5cf   : > { %v971_v17 = vpop.permute.xlu1 %970 }
 0x5d0   : > { %1664 = vmatmul.mubr.msk.f32.vlgmr.msra.gmra.mrb[6].mxu0 %vm455_vm2, %v971_v17 }
 0x5d1   : > { %1711 = vmatpush3.bf16.msra.mxu0 %v2270_v9  ;;  %1677 = vmatprep.mubr.msk.f32.mxu0 %vm2015_vm1, %v2016_v7  ;;  %v1072_v9 = vsel %vm1071_vm8, 1, %v2017_v14 }
 0x6a3   : > { %v1040_v19 = vpop.f32.mrb[6].mxu0 }
 0x6a4   : > { %v1041_v20 = vadd.f32 %v2303_v15, %v1040_v19  ;;  %v1665_v21 = vpop.f32.mrb[7].mxu0 }
 0x6a6   : > { %1052 = vrot.lane.b32.xlu0 %v1041_v20, %s2018_s18  ;;  %v1044_v24 = vadd.f32 %v1041_v20, %v968_v22 }
 0x6a8   : > { %v1575_v25 = vmul.f32 -1.442695, %v1044_v24 }
 0x6aa   : > { %1074 = vperm.xlu0 %1831, %v1072_v9   ;;  %1844 = vpow2.f32 %v1575_v25 }
 0x6b4   : > { %v1845_v26 = vpop.eup %1844 }
 0x6b5   : > { %v1048_v27 = vadd.f32 1.0, %v1845_v26 }
 0x6b7   : > { %1846 = vrcp.f32 %v1048_v27 }
 0x6c1   : > { %v1847_v28 = vpop.eup %1846 }
 0x6c2   : > { %v1062_v34 = vsub.f32 1.0, %v1847_v28  ;;  %v1068_v37 = vmul.f32 %v1847_v28, %v963_v16 }
 0x718   : > { %v1053_v29 = vpop.permute.xlu0 %1052 }
 0x719   : > { %v1055_v30 = vmul.f32 %v1847_v28, %v1053_v29 }
 0x71b   : > { %1057 = vrot.lane.b32.xlu1 %v1055_v30, %s2019_s19 }
 0x729   : > { %v1075_v36 = vpop.permute.xlu0 %1074 }
 0x72a   : > { %vm1076_vm9 = vcmp.eq.s32.totalorder %v1075_v36, 1 }
 0x78d   : > { %v1058_v31 = vpop.permute.xlu1 %1057 }
 0x78e   : > { %v1060_v32 = vadd.f32 %v1058_v31, %v968_v22 }
 0x790   : > { %1848 = vtanh.f32 %v1060_v32 }
 0x79a   : > { %v1849_v33 = vpop.eup %1848 }
 0x79b   : > { %1064 = vrot.lane.b32.xlu1 %v1849_v33, %s2021_s0 }
 0x80d   : > { %v1065_v35 = vpop.permute.xlu1 %1064 }
 0x80e   : > { %v1067_v38 = vmul.f32 %v1065_v35, %v1062_v34 }
 0x810   : > { %v1069_v39 = vadd.f32 %v1068_v37, %v1067_v38 }
 0x812   : > { %v1155_v40 = vsel %vm1076_vm9, %v1069_v39, %v963_v16  ;;  %v1077_v41 = vsel %vm1076_vm9, %v1069_v39, 0.0 }
 0x813   : > { %1162 = vrot.lane.b32.xlu0 %v1155_v40, %s2021_s0 }
 0x885   : > { %v1163_v42 = vpop.permute.xlu0 %1162 }
 0x886   : > { %1678 = vmatmul.mubr.msk.f32.vlgmr.msra.gmra.mrb[8].mxu0 %vm455_vm2, %v1163_v42 }
 0x959   : > { %v1232_v44 = vpop.f32.mrb[8].mxu0 }
 0x95a   : > { %v1233_v45 = vadd.f32 %v2303_v15, %v1232_v44  ;;  %v1679_v46 = vpop.f32.mrb[9].mxu0  ;;  %v1160_v15 = vld [vmem:[%s1159_s15] sm:$0xff] }
 0x95c   : > { %1244 = vrot.lane.b32.xlu1 %v1233_v45, %s2018_s18  ;;  %v1236_v23 = vadd.f32 %v1233_v45, %v1160_v15  ;;  %s1153_s18 = scalar_lea.vmem [#allocation4], %s1573_s14  ;;  %s1890_s14 = sshll.u32 %s2022_s10, 4  ;;  %s1891_s14 = int_to_ptr.vmem [resolvable:$false] %s1890_s14 }
 0x95d   : > { %s1892_s9 = scalar_lea.vmem %s1891_s14, 1024  ;;  %p1893_p9 = scmp.lt.s32.totalorder %s2447_s26, %s1891_s14 }
 0x95e   : > { %v1579_v52 = vmul.f32 -1.442695, %v1236_v23  ;;  %p1894_p5 = scmp.lt.s32.totalorder %s1892_s9, %s1886_s16 }
 0x960   : > { %1266 = vperm.xlu1 %1830, %v1264_v47   ;;  %1850 = vpow2.f32 %v1579_v52  ;;  %p1895_p11 = por %p1894_p5, %p1893_p9 }
 0x962   : > { %p1896_p12 = pnand %p1895_p11, %p1889_p6 }
 0x964   : > { %694 = vrot.lane.b32.xlu1 %v2338_v50, %s2021_s0 }
 0x968   : > { %1079 = vrot.lane.b32.xlu1 %v1077_v41, %s2021_s0 }
 0x96a   : > { %v1851_v14 = vpop.eup %1850 }
 0x96b   : > { %v1240_v53 = vadd.f32 1.0, %v1851_v14 }
 0x96d   : > { %1852 = vrcp.f32 %v1240_v53 }
 0x977   : > { %v1853_v54 = vpop.eup %1852 }
 0x978   : > { %v1254_v63 = vsub.f32 1.0, %v1853_v54  ;;  %v1260_v1 = vmul.f32 %v1853_v54, %v1155_v40 }
 0x9ce   : > { %v1245_v55 = vpop.permute.xlu1 %1244 }
 0x9cf   : > { %v1247_v56 = vmul.f32 %v1853_v54, %v1245_v55 }
 0x9d1   : > { %1249 = vrot.lane.b32.xlu0 %v1247_v56, %s2019_s19  ;;  %s1379_s19 = sadd.s32 %s1583_s20, %s2321_s23  ;;  %s2455_s23 = scalar_lea.sflag [#allocation7], %s2560_s8 }
 0x9df   : > { %v1267_v57 = vpop.permute.xlu1 %1266 }
 0x9e0   : > { %vm1268_vm12 = vcmp.eq.s32.totalorder %v1267_v57, 1 }
 0x9e3   : > { %v695_v50 = vpop.permute.xlu1 %694 }
 0x9e4   : > { %1643 = vmatmul.mubr.msk.f32.vlgmr.msra.gmra.mrb[2].mxu1 %vm455_vm2, %v695_v50 }
 0x9e5   : > { %1702 = vmatpush3.bf16.msra.mxu1 %v1695_v51  ;;  %1656 = vmatprep.mubr.msk.f32.mxu1 %vm2015_vm1, %v2016_v7 }
 0x9e6   : > { %1706 = vmatprep.subr.bf16.mxu1 %v2014_v4 }
 0x9e7   : > { %v1080_v10 = vpop.permute.xlu1 %1079 }
 0xa43   : > { %v1250_v58 = vpop.permute.xlu0 %1249 }
 0xa44   : > { %v1252_v59 = vadd.f32 %v1250_v58, %v1160_v15 }
 0xa46   : > { %1854 = vtanh.f32 %v1252_v59 }
 0xa50   : > { %v1855_v60 = vpop.eup %1854 }
 0xa51   : > { %1256 = vrot.lane.b32.xlu0 %v1855_v60, %s2021_s0 }
 0xa55   : > { %887 = vrot.lane.b32.xlu0 %v2361_v13, %s2021_s0 }
 0xab7   : > { %v764_v61 = vpop.f32.mrb[2].mxu1 }
 0xab8   : > { %770 = vst.msk [vmem:[%s768_s24] sm:$0xff] %vm769_vm11, %v764_v61  ;;  %v1644_v62 = vpop.f32.mrb[3].mxu1 }
 0xac3   : > { %v1257_v0 = vpop.permute.xlu0 %1256 }
 0xac4   : > { %v1259_v2 = vmul.f32 %v1257_v0, %v1254_v63 }
 0xac6   : > { %v1261_v3 = vadd.f32 %v1260_v1, %v1259_v2 }
 0xac7   : > { %v888_v5 = vpop.permute.xlu0 %887 }
 0xac8   : > { %1657 = vmatmul.mubr.msk.f32.vlgmr.msra.gmra.mrb[4].mxu1 %vm455_vm2, %v888_v5  ;;  %v1269_v6 = vsel %vm1268_vm12, %v1261_v3, 0.0  ;;  %v1347_v8 = vsel %vm1268_vm12, %v1261_v3, %v1155_v40 }
 0xac9   : > { %1271 = vrot.lane.b32.xlu0 %v1269_v6, %s2021_s0  ;;  %1349 = vrot.lane.b32.xlu1 %v1347_v8, %s2021_s0  ;;  %s1584_s0 = sshll.u32 %s1379_s19, 7 }
 0xaca   : > { %1708 = vmatpush3.bf16.msra.mxu1 %v1695_v51  ;;  %1670 = vmatprep.mubr.msk.f32.mxu1 %vm2015_vm1, %v2016_v7  ;;  %s2445_s17 = scalar_lea.hbm %s2523_s7, %s1584_s0 }
 0xacb   : > { %1712 = vmatprep.subr.bf16.mxu1 %v2014_v4 }
 0xacd   : > { %1671 = vmatmul.mubr.msk.f32.vlgmr.msra.gmra.mrb[6].mxu1 %vm455_vm2, %v1080_v10 }
 0xace   : > { %1714 = vmatpush3.bf16.msra.mxu1 %v1695_v51  ;;  %1684 = vmatprep.mubr.msk.f32.mxu1 %vm2015_vm1, %v2016_v7 }
 0xb3b   : > { %v1272_v11 = vpop.permute.xlu0 %1271  ;;  %v1350_v12 = vpop.permute.xlu1 %1349 }
 0xb3c   : > { %1352 = vst.msk [vmem:[#allocation2] sm:$0xff] %vm455_vm2, %v1350_v12  ;;  %1685 = vmatmul.mubr.msk.f32.vlgmr.msra.gmra.mrb[8].mxu1 %vm455_vm2, %v1272_v11 }
 0xb9b   : > { %v957_v13 = vpop.f32.mrb[4].mxu1 }
 0xb9c   : > { %962 = vst.msk [vmem:[%s961_s22] sm:$0xff] %vm769_vm11, %v957_v13  ;;  %v1658_v4 = vpop.f32.mrb[5].mxu1 }
 0xba0   : > { %v1149_v16 = vpop.f32.mrb[6].mxu1 }
 0xba1   : > { %1154 = vst.msk [vmem:[%s1153_s18] sm:$0xff] %vm769_vm11, %v1149_v16  ;;  %v1672_v7 = vpop.f32.mrb[7].mxu1 }
 0xba8   : > { %v1354_v17 = vld [vmem:[#allocation4 + $0x8] sm:$0xff]  ;;  %v1355_v18 = vld [vmem:[#allocation4 + $0x10] sm:$0xff] }
 0xba9   : > { %1358 = vst.msk [vmem:[%s2263_s11 + $0x8] sm:$0xff] %vm769_vm11, %v1354_v17  ;;  %1359 = vst.msk [vmem:[%s2263_s11 + $0x10] sm:$0xff] %vm769_vm11, %v1355_v18 }
 0xc0f   : > { %v1341_v19 = vpop.f32.mrb[8].mxu1 }
 0xc10   : > { %1346 = vst.msk [vmem:[%s1345_s21] sm:$0xff] %vm769_vm11, %v1341_v19  ;;  %v1686_v20 = vpop.f32.mrb[9].mxu1 }
 0xc17   : > { %v1353_v21 = vld [vmem:[#allocation4] sm:$0xff]  ;;  %v1356_v9 = vld [vmem:[#allocation4 + $0x18] sm:$0xff] }
 0xc18   : > { %1357 = vst.msk [vmem:[%s2263_s11] sm:$0xff] %vm769_vm11, %v1353_v21  ;;  %1360 = vst.msk [vmem:[%s2263_s11 + $0x18] sm:$0xff] %vm769_vm11, %v1356_v9 }
 0xc19   : > { %1899 = shalt.err (!%p1896_p12)
}
 0xc1a   : > { %s1900_s11 = scalar_lea.hbm %s2445_s17, 512  ;;  %s1904_s27 = scalar_lea.hbm %s2523_s7, 2048 }
 0xc1b   : > { %p1901_p4 = scmp.ne.s32.totalorder %s2445_s17, %s1900_s11  ;;  %p1905_p0 = scmp.lt.u32.totalorder %s2445_s17, %s2523_s7 }
 0xc1c   : > { %p1906_p7 = scmp.lt.u32.totalorder %s1904_s27, %s1900_s11  ;;  %p1908_p3 = scmp.lt.u32.totalorder %s1900_s11, %s2445_s17 }
 0xc1d   : > { %p1902_p8 = pnand %p1901_p4, %p2561_p13 }
 0xc1e   : > { %p1907_p2 = por %p1906_p7, %p1905_p0 }
 0xc1f   : > { %p1903_p10 = pneg %p1902_p8 }
 0xc20   : > { %p1909_p1 = por %p1908_p3, %p1907_p2 }
 0xc22   : > { %p1910_p6 = pnand %p1909_p1, %p1903_p10 }
 0xc24   : > { %1913 = shalt.err (!%p1910_p6)
}
 0xc25   : > { %s2023_s22 = smov 128   ;;  %s2024_s18 = smov 8  }
 0xc26   : > { %1717 = dma.vmem_to_hbm [thread:$0]  (%p2561_p13), %s2447_s26, 512, %s2445_s17, %s2455_s23, %s2023_s22, %s2023_s22, %s2024_s18  }
 0xc27 PF: > { %s2562_s20 = sld [smem:[#allocation17_spill]]  ;;  %s2563_s19 = sld [smem:[#allocation11_spill]] }
 0xc28   : > { %s2564_s21 = sld [smem:[#allocation22_spill]] }
 0xc2d   : > { %p1728_p9 = scmp.ge.s32.totalorder %s2562_s20, 2  ;;  %s1397_s0 = sand.u32 1, %s2563_s19  }
 0xc2e   : > { %p2565_p5 = scmp.ne.s32.totalorder %s2564_s21, 0  ;;  %s1398_s28 = scalar_lea.sflag [#allocation7], %s1397_s0 }
 0xc30   : > { %p1724_p11 = pnand %p1728_p9, %p2565_p5 }
 0xc32   : > { %1963 = dma.done.wait (!%p1724_p11), %s1398_s28, 512  }
 0xc33   : > { %1965 = vsyncadd (!%p1724_p11), %s1398_s28, 4294966784  ;;  %s23_s11 = sadd.s32 1, %s2562_s20   ;;  %s2566_s29 = sld [smem:[#allocation12_spill]] }
 0xc34   : > { %p20_p12 = scmp.ge.s32.totalorder %s23_s11, 6   ;;  %s2567_s26 = sld [smem:[#allocation21_spill]] }
 0xc35   : > { %s2568_s27 = sld [smem:[#allocation13_spill]]  ;;  %s2569_s28 = sld [smem:[#allocation14_spill]] }
 0xc36   : > { %s2570_s13 = sld [smem:[#allocation20_spill]]  ;;  %s2571_s30 = sld [smem:[#allocation15_spill]] }
 0xc37   : > { %s2572_s8 = sld [smem:[#allocation16_spill]]  ;;  %s2573_s9 = sld [smem:[#allocation18_spill]] }
 0xc38   : > { %s2574_s10 = sld [smem:[#allocation19_spill]]  ;;  %s2575_s24 = smov %s1972_s25 }
 0xc39   : > { %s2576_s25 = smov %s2566_s29  ;;  %22 = sbr.rel (!%p20_p12) target bundleno = 11 (0xb), region = 120 }
 0xc3c   : > { %s2577_s29 = smov %s2570_s13 }
 0xc40   :  { %1403 = vsyncpa [#allocation6], 1 }
 0xc41   :  { %1405 = vsyncpa [#allocation6 + $0x1], 1 }
 0xc42   :  { %1406 = vsyncpa [#allocation7], 1 }
 0xc43   :  { %1408 = vsyncpa [#allocation7 + $0x1], 1 }

// kernel: tpu_custom_call.1
= control target key start
LH: loop header
LB: loop body
LE: loop exit
PB: predicated region body
PF: predicated region fallthrough
CT: control target
= control target key end

     0   :  { %s2516_s0 = inlined_call_operand.hbm [shape: f32[8,8,16], index: 0, kind: input, shape index: {}]   ;;  %s2517_s1 = inlined_call_operand.vmem [shape: s32[8,1], index: 1, kind: input, shape index: {}]   ;;  %s2518_s2 = inlined_call_operand.vmem [shape: f32[2,16,48], index: 2, kind: input, shape index: {}]   ;;  %s2519_s3 = inlined_call_operand.vmem [shape: f32[2,16,48], index: 3, kind: input, shape index: {}]   ;;  %s2520_s4 = inlined_call_operand.vmem [shape: f32[2,1,48], index: 4, kind: input, shape index: {}]   ;;  %s2521_s5 = inlined_call_operand.vmem [shape: f32[2,1,48], index: 5, kind: input, shape index: {}]   ;;  %s2522_s6 = inlined_call_operand.vmem [shape: f32[2,16,8], index: 6, kind: input, shape index: {}]   ;;  %s2523_s7 = inlined_call_operand.hbm [shape: f32[2,8,8,8], index: 7, kind: output, shape index: {}]  }
   0x1   :  { %2538 = sst [smem:[#allocation23_spill]] %s2516_s0 }
   0x2   :  { %12 = vsyncpa [#allocation6], 0 }
   0x3   :  { %14 = vsyncpa [#allocation6 + $0x1], 0 }
   0x4   :  { %15 = vsyncpa [#allocation7], 0 }
   0x5   :  { %17 = vsyncpa [#allocation7 + $0x1], 0  ;;  %s2065_s24 = smov 0   ;;  %s2067_s25 = smov 0  }
   0x6   :  { %s2069_s26 = smov 0   ;;  %s2071_s27 = smov 0  }
   0x7   :  { %s2073_s28 = smov 0   ;;  %s2075_s29 = smov 0  }
   0x8   :  { %s2077_s30 = smov 0   ;;  %s2079_s8 = smov 0  }
   0x9   :  { %s2081_s9 = smov 0   ;;  %s2083_s10 = smov 0  }
   0xa   :  { %s2085_s11 = smov 0  }
   0xb LB: > { %2539 = sst [smem:[#allocation11_spill]] %s1968_s24  ;;  %s2526_s12 = sadd.s32 4294967295, %s2008_s11   ;;  %s2008_s11 = sphi %s2085_s11, %s23_s11   ;;  %s2004_s10 = sphi %s2083_s10, %s2574_s10   ;;  %s2000_s9 = sphi %s2081_s9, %s2573_s9   ;;  %s1996_s8 = sphi %s2079_s8, %s2572_s8   ;;  %s1992_s30 = sphi %s2077_s30, %s2571_s30   ;;  %s1988_s29 = sphi %s2075_s29, %s2577_s29   ;;  %s1984_s28 = sphi %s2073_s28, %s2569_s28   ;;  %s1980_s27 = sphi %s2071_s27, %s2568_s27   ;;  %s1976_s26 = sphi %s2069_s26, %s2567_s26   ;;  %s1972_s25 = sphi %s2067_s25, %s2576_s25   ;;  %s1968_s24 = sphi %s2065_s24, %s2575_s24  }
   0xc   : > { %2540 = sst [smem:[#allocation12_spill]] %s1976_s26  ;;  %s32_s14 = sadd.s32 1, %s2000_s9 }
   0xd   : > { %2541 = sst [smem:[#allocation13_spill]] %s1984_s28  ;;  %s35_s15 = sadd.s32 1, %s2004_s10 }
   0xe   : > { %2542 = sst [smem:[#allocation14_spill]] %s1988_s29  ;;  %p33_p0 = scmp.ge.s32.totalorder %s32_s14, 2 }
   0xf   : > { %2543 = sst [smem:[#allocation15_spill]] %s2000_s9  ;;  %s39_s16 = ssub.s32 1, %s2000_s9 }
  0x10   : > { %2544 = sst [smem:[#allocation16_spill]] %s2004_s10  ;;  %s40_s17 = smul.u32 %s2004_s10, %s39_s16 }
  0x11   : > { %2545 = sst [smem:[#allocation17_spill]] %s2008_s11  ;;  %s41_s18 = ssub.s32 1, %s2004_s10 }
  0x12   : > { %s2579_s14 = smov (%p33_p0, %s32_s14), 0  ;;  %s2581_s15 = smov (!%p33_p0, %s35_s15), %s2004_s10 }
  0x13   : > { %2546 = sst [smem:[#allocation18_spill]] %s2579_s14  ;;  %s42_s19 = smul.u32 %s2000_s9, %s41_s18 }
  0x14   : > { %s44_s20 = ssub.s32 1, %s2579_s14  ;;  %p37_p1 = scmp.ge.s32.totalorder %s2581_s15, 2 }
  0x15   : > { %s52_s21 = sadd.s32 1, %s1988_s29  ;;  %s2133_s22 = sadd.s32 %s42_s19, %s40_s17 }
  0x16   : > { %p59_p2 = scmp.ne.s32.totalorder %s1988_s29, %s1984_s28  ;;  %s2583_s15 = smov (%p37_p1, %s2581_s15), 0 }
  0x17   : > { %2547 = sst [smem:[#allocation19_spill]] %s2583_s15  ;;  %p60_p3 = scmp.eq.s32.totalorder %s2008_s11, 0 }
  0x18   : > { %p65_p4 = scmp.ne.s32.totalorder %s1984_s28, %s1980_s27  ;;  %s45_s23 = smul.u32 %s44_s20, %s2583_s15 }
  0x19   : > { %s46_s16 = ssub.s32 1, %s2583_s15  ;;  %p2145_p5 = por %p60_p3, %p59_p2 }
  0x1a   : > { %s47_s17 = smul.u32 %s46_s16, %s2579_s14  ;;  %p66_p6 = scmp.eq.s32.totalorder %s2526_s12, 0 }
  0x1b   : > { %s236_s19 = ssub.s32 %s2004_s10, %s2583_s15  ;;  %s241_s9 = sadd.s32 1, %s1976_s26 }
  0x1c   : > { %s48_s13 = sadd.s32 %s47_s17, %s45_s23  ;;  %p2155_p7 = por %p66_p6, %p65_p4 }
  0x1d   : > { %s49_s27 = ssub.s32 %s2133_s22, %s48_s13  ;;  %p251_p10 = scmp.ne.s32.totalorder %s1976_s26, %s1972_s25 }
  0x1e   : > { %p50_p8 = scmp.eq.s32.totalorder %s49_s27, 0  ;;  %s238_s16 = sor.u32 %s236_s19, %s49_s27 }
  0x1f   : > { %p239_p9 = scmp.eq.s32.totalorder %s238_s16, 0  ;;  %s2552_s15 = sadd.s32 4294967295, %s2008_s11  }
  0x20   : > { %s2162_s14 = scalar_select %p50_p8, %s1988_s29, %s52_s21  }
  0x21   : > { %s2165_s12 = scalar_select %p239_p9, %s1976_s26, %s241_s9  }
  0x22   : > { %2550 = sst [smem:[#allocation20_spill]] %s2162_s14  ;;  %p252_p11 = scmp.eq.s32.totalorder %s2552_s15, 3 }
  0x23   : > { %2551 = sst [smem:[#allocation21_spill]] %s2165_s12  ;;  %p257_p12 = scmp.ne.s32.totalorder %s1972_s25, %s1968_s24 }
  0x24   : > { %s2553_s23 = sadd.s32 4294967294, %s2008_s11   ;;  %p2173_p0 = por %p252_p11, %p251_p10 }
  0x25   : > { %p258_p13 = scmp.eq.s32.totalorder %s2553_s23, 3  ;;  %p1727_p1 = scmp.lt.s32.totalorder %s2008_s11, 4 }
  0x26   : > { %s2554_s13 = scalar_select %p2173_p0, 1, 0 }
  0x27   : > { %p2178_p2 = por %p258_p13, %p257_p12  ;;  %s281_s19 = sand.u32 1, %s1988_s29  }
  0x28   : > { %s1545_s21 = sshll.u32 %s281_s19, 5  ;;  %s1587_s27 = sshll.u32 %s2133_s22, 9 }
  0x29   : > { %s2555_s17 = scalar_select %p2178_p2, 1, 0 }
  0x2a   : > { %s2557_s0 = sld [smem:[#allocation23_spill]]  ;;  %s285_s15 = scalar_lea.vmem [#allocation5], %s1545_s21 }
  0x2b   : > { %2556 = sst [smem:[#allocation22_spill]] %s2555_s17  ;;  %s297_s23 = sshll.u32 %s285_s15, 4  ;;  %s2189_s23 = int_to_ptr.vmem [resolvable:$true] %s297_s23 }
  0x2c   : > { %p2193_p3 = pnand %p1727_p1, %p2145_p5  ;;  %s2198_s22 = scalar_lea.sflag [#allocation6], %s281_s19 }
  0x2e   : > { %p1858_p8 = pneg %p2193_p3 }
  0x30   : > { %s2187_s10 = scalar_lea.hbm %s2557_s0, %s1587_s27  ;;  %s1861_s18 = scalar_lea.hbm %s2557_s0, 1024 }
  0x31   : > { %s1856_s27 = scalar_lea.hbm %s2187_s10, 512  ;;  %p1862_p5 = scmp.lt.u32.totalorder %s2187_s10, %s2557_s0 }
  0x32   : > { %p1857_p6 = scmp.ne.s32.totalorder %s2187_s10, %s1856_s27  ;;  %p1863_p11 = scmp.lt.u32.totalorder %s1861_s18, %s1856_s27 }
  0x33   : > { %p1865_p13 = scmp.lt.u32.totalorder %s1856_s27, %s2187_s10 }
  0x34   : > { %p1859_p9 = pnand %p1858_p8, %p1857_p6  ;;  %p1864_p12 = por %p1863_p11, %p1862_p5 }
  0x36   : > { %p1860_p10 = pneg %p1859_p9  ;;  %p1866_p1 = por %p1865_p13, %p1864_p12 }
  0x38   : > { %p1867_p4 = pnand %p1866_p1, %p1860_p10 }
  0x3a   : > { %1870 = shalt.err (!%p1867_p4)
}
  0x3b   : > { %s1871_s19 = scalar_lea.vmem %s2189_s23, 512  ;;  %s2010_s21 = smov [#allocation5]  }
  0x3c   : > { %p1872_p6 = scmp.ne.s32.totalorder %s2189_s23, %s1871_s19  ;;  %s1876_s16 = sshll.u32 %s2010_s21, 4  ;;  %s1877_s16 = int_to_ptr.vmem [resolvable:$false] %s1876_s16 }
  0x3d   : > { %s1878_s9 = scalar_lea.vmem %s1877_s16, 1024  ;;  %p1879_p0 = scmp.lt.s32.totalorder %s2189_s23, %s1877_s16 }
  0x3e   : > { %p1874_p9 = pnand %p1872_p6, %p1858_p8  ;;  %p1880_p5 = scmp.lt.s32.totalorder %s1878_s9, %s1871_s19 }
  0x40   : > { %p1875_p2 = pneg %p1874_p9  ;;  %p1881_p11 = por %p1880_p5, %p1879_p0 }
  0x42   : > { %p1882_p12 = pnand %p1881_p11, %p1875_p2 }
  0x44   : > { %1885 = shalt.err (!%p1882_p12)
}
  0x45   : > { %s2011_s27 = smov 128   ;;  %s2012_s18 = smov 8  }
  0x46   : > { %1722 = dma.hbm_to_vmem [thread:$0]  (!%p2193_p3), %s2187_s10, 512, %s2189_s23, %s2198_s22, %s2011_s27, %s2011_s27, %s2012_s18  }
  0x47   : > { %p341_p4 = scmp.lt.s32.totalorder %s2008_s11, 5  ;;  %p2559_p8 = scmp.ge.s32.totalorder %s2008_s11, 1 }
  0x49   : > { %p342_p10 = pnand %p2559_p8, %p341_p4 }
  0x4a   : > { %s347_s15 = sand.u32 (!%p342_p10), 1, %s1984_s28  }
  0x4b   : > { %345 = sbr.rel (%p342_p10) target bundleno = 3111 (0xc27), region = 48  ;;  %s1549_s19 = sshll.u32 (!%p342_p10), %s347_s15, 5 }
  0x4c   : > { %s348_s21 = scalar_lea.sflag (!%p342_p10), [#allocation6], %s347_s15  ;;  %s2230_s16 = scalar_lea.vmem (!%p342_p10), [#allocation5], %s1549_s19 }
  0x52   : > { %1959 = dma.done.wait (%p2155_p7), %s348_s21, 512  }
  0x53   : > { %1961 = vsyncadd (%p2155_p7), %s348_s21, 4294966784  ;;  %s2532_s10 = sand.u32 1, %s1972_s25   ;;  %p409_p0 = scmp.lt.s32.totalorder %s1996_s8, 1 }
  0x54   : > { %s1550_s14 = sshll.u32 %s2532_s10, 5  ;;  %p1557_p7 = scmp.ne.s32.totalorder %s1992_s30, 0 }
  0x55   : > { %s2241_s23 = scalar_select %p409_p0, %s1996_s8, 1 }
  0x56   : > { %s2263_s11 = scalar_lea.vmem [#allocation8], %s1550_s14  ;;  %439 = sbr.rel (%p1557_p7) target bundleno = 93 (0x5d), region = 56  ;;  %vm440_vm0 = vcmask (!%p1557_p7), 130048   ;;  %v2013_v0 = vmov (!%p1557_p7), 0.0  }
  0x57   : > { %s1588_s22 = sshll.u32 %s2241_s23, 4  ;;  %s421_s18 = scalar_lea.vmem %s2520_s4, %s2241_s23  ;;  %441 = vst.msk [vmem:[#allocation2] sm:$0xff] (!%p1557_p7), %vm440_vm0, %v2013_v0 }
  0x58   : > { %s413_s19 = scalar_lea.vmem %s2518_s2, %s1588_s22  ;;  %s418_s29 = scalar_lea.vmem %s2519_s3, %s1588_s22 }
  0x59   : > { %s424_s12 = scalar_lea.vmem %s2521_s5, %s2241_s23  ;;  %s2261_s24 = scalar_lea.vmem %s2522_s6, %s1588_s22 }
  0x5d PF: > { %v446_v1 = vld [vmem:[%s413_s19] sm:$0xff]  ;;  %v447_v2 = vld [vmem:[%s413_s19 + $0x8] sm:$0xff]  ;;  %v2014_v4 = vmov 0.0|0.0   ;;  %vm2015_vm1 = vmmov 0   ;;  %v2016_v7 = vmov 0.0   ;;  %vm455_vm2 = vcmask 130048  }
  0x5e   : > { %v558_v3 = vld [vmem:[%s418_s29] sm:$0xff]  ;;  %1691 = vmatprep.subr.bf16.mxu1 %v2014_v4  ;;  %v1687_v5 = vpack.c.bf16 %v447_v2, %v446_v1  ;;  %v559_v6 = vld [vmem:[%s418_s29 + $0x8] sm:$0xff]  ;;  %1635 = vmatprep.mubr.msk.f32.mxu1 %vm2015_vm1, %v2016_v7  ;;  %v443_v11 = vld [vmem:[%s2230_s16 + $0x8] sm:$0xff]  ;;  %p571_p2 = scmp.eq.s32.totalorder %s1996_s8, 0  ;;  %s564_s0 = ssub.s32 1, %s1992_s30  ;;  %v2017_v14 = vmov 0  }
  0x5f   : > { %v442_v8 = vld [vmem:[%s2230_s16] sm:$0xff]  ;;  %v2270_v9 = vpack.c.bf16 %v559_v6, %v558_v3  ;;  %v2274_v10 = vld [vmem:[#allocation2] sm:$0xff]  ;;  %v444_v12 = vld [vmem:[%s2230_s16 + $0x10] sm:$0xff]  ;;  %s566_s26 = ssub.s32 1, %s1996_s8  ;;  %1830 = vset.pattern.permute.xlu1 %v2017_v14  ;;  %s565_s28 = smul.u32 %s1996_s8, %s564_s0  ;;  %1831 = vset.pattern.permute.xlu0 %v2017_v14  ;;  %vm553_vm3 = vcmask 392192   ;;  %vm769_vm11 = vcmask 64512  }
  0x60   : > { %1625 = vmatprep.mubr.msk.f32.mxu0 %vm455_vm2, %v442_v8  ;;  %1688 = vmatprep.subr.bf16.mxu0 %v1687_v5  ;;  %v445_v13 = vld [vmem:[%s2230_s16 + $0x18] sm:$0xff]  ;;  %s567_s16 = smul.u32 %s1992_s30, %s566_s26  ;;  %s2019_s19 = smov 32  }
  0x61   : > { %1693 = vmatpush3.bf16.msra.mxu1 %v2270_v9  ;;  %1690 = vmatpush3.bf16.msra.mxu0 %v1687_v5  ;;  %v2303_v15 = vld [vmem:[%s424_s12] ss:$0 sm:$0xff]  ;;  %s2313_s22 = scalar_select %p571_p2, 0, 3 }
  0x62   : > { %1697 = vmatprep.subr.bf16.mxu0 %v2014_v4  ;;  %1694 = vmatprep.subr.bf16.mxu1 %v2014_v4  ;;  %v1558_v16 = vld [vmem:[%s421_s18] ss:$0 sm:$0xff]  ;;  %s568_s9 = sadd.s32 %s567_s16, %s565_s28  ;;  %s2018_s18 = smov 96  }
  0x63   : > { %v2319_v23 = vld [vmem:[%s2517_s1] sm:$0xff]  ;;  %s2321_s23 = sshll.u32 %s568_s9, 2  ;;  %s1564_s20 = sshll.u32 %s2313_s22, 3 }
  0x64   : > { %1636 = vmatmul.mubr.msk.f32.vlgmr.msra.gmra.mrb[0].mxu1 %vm455_vm2, %v2274_v10  ;;  %1626 = vmatmul.mubr.msk.f32.vlgmr.msra.gmra.mrb[0].mxu0 %vm455_vm2, %v443_v11  ;;  %s573_s27 = sadd.s32 %s2321_s23, %s2313_s22  ;;  %s575_s15 = scalar_lea.vmem [#allocation3], %s1564_s20 }
  0x65   : > { %1628 = vmatprep.mubr.msk.f32.mxu0 %vm455_vm2, %v444_v12  ;;  %1699 = vmatpush3.bf16.msra.mxu0 %v2270_v9  ;;  %v685_v25 = vstv %s573_s27  ;;  %s2020_s21 = smov 16   ;;  %s2021_s0 = smov 112  }
  0x66   : > { %1703 = vmatprep.subr.bf16.mxu0 %v2014_v4  ;;  %1642 = vmatprep.mubr.msk.f32.mxu1 %vm2015_vm1, %v2016_v7  ;;  %vm686_vm4 = vcmp.lt.s32.totalorder %v685_v25, %v2319_v23  ;;  %s2350_s26 = scalar_select %p571_p2, 1, 2 }
  0x67   : > { %v687_v29 = vsel %vm686_vm4, 1, %v2017_v14  ;;  %s2370_s16 = scalar_select %p571_p2, 2, 1 }
  0x68   : > { %1629 = vmatmul.mubr.msk.f32.gmra.mrb[2].mxu0 %vm455_vm2, %v445_v13  ;;  %689 = vperm.xlu1 %1830, %v687_v29   ;;  %s1569_s28 = sshll.u32 %s2350_s26, 3  ;;  %s773_s17 = sadd.s32 %s2321_s23, %s2350_s26 }
  0x69   : > { %1649 = vmatprep.mubr.msk.f32.mxu0 %vm2015_vm1, %v2016_v7  ;;  %s775_s29 = scalar_lea.vmem [#allocation3], %s1569_s28  ;;  %v878_v60 = vstv %s773_s17  ;;  %s965_s10 = sadd.s32 %s2321_s23, %s2370_s16 }
  0x6a   : > { %vm879_vm6 = vcmp.lt.s32.totalorder %v878_v60, %v2319_v23  ;;  %s1573_s14 = sshll.u32 %s2370_s16, 3  ;;  %s961_s22 = scalar_lea.vmem [#allocation4], %s1569_s28 }
  0x6b   : > { %v880_v61 = vsel %vm879_vm6, 1, %v2017_v14  ;;  %s967_s9 = scalar_lea.vmem [#allocation3], %s1573_s14  ;;  %s1382_s26 = sshll.u32 %s2263_s11, 4  ;;  %s2447_s26 = int_to_ptr.vmem [resolvable:$true] %s1382_s26 }
  0x6c   : > { %s2387_s12 = scalar_select %p571_p2, 3, 0 }
  0x6d   : > { %s1886_s16 = scalar_lea.vmem %s2447_s26, 512  ;;  %p2561_p13 = scmp.ne.s32.totalorder %s2554_s13, 0 }
  0x6e   : > { %s1157_s30 = sadd.s32 %s2321_s23, %s2387_s12  ;;  %s1577_s27 = sshll.u32 %s2387_s12, 3 }
  0x6f   : > { %p1887_p3 = scmp.ne.s32.totalorder %s2447_s26, %s1886_s16 }
  0x71   : > { %p1888_p1 = pnand %p1887_p3, %p2561_p13 }
  0x73   : > { %p1889_p6 = pneg %p1888_p1 }
  0xe7   : > { %v690_v42 = vpop.permute.xlu1 %689 }
  0xe8   : > { %vm691_vm5 = vcmp.eq.s32.totalorder %v690_v42, 1 }
 0x137   : > { %v652_v17 = vpop.f32.mrb[0].mxu1  ;;  %v1627_v18 = vpop.f32.mrb[0].mxu0 }
 0x138   : > { %v653_v19 = vadd.f32 %v2303_v15, %v652_v17  ;;  %v1637_v20 = vpop.f32.mrb[1].mxu1  ;;  %v540_v21 = vadd.f32 %v1627_v18, %v1558_v16  ;;  %v534_v22 = vpop.f32.mrb[1].mxu0  ;;  %v1070_v18 = vstv %s965_s10  ;;  %s2022_s10 = smov [#allocation8]  }
 0x139   : > { %v535_v24 = vadd.f32 %v1558_v16, %v534_v22  ;;  %vm1071_vm8 = vcmp.lt.s32.totalorder %v1070_v18, %v2319_v23 }
 0x13a   : > { %664 = vrot.lane.b32.xlu0 %v653_v19, %s2018_s18  ;;  %555 = vst.msk [vmem:[#allocation3 + $0x8] sm:$0xff] %vm553_vm3, %v540_v21 }
 0x13b   : > { %554 = vst.msk [vmem:[#allocation3] sm:$0xff] %vm553_vm3, %v535_v24  ;;  %v1630_v26 = vpop.f32.mrb[2].mxu0 }
 0x13c   : > { %v550_v27 = vadd.f32 %v1630_v26, %v1558_v16  ;;  %v544_v28 = vpop.f32.mrb[3].mxu0 }
 0x13d   : > { %v545_v30 = vadd.f32 %v1558_v16, %v544_v28 }
 0x13e   : > { %557 = vst.msk [vmem:[#allocation3 + $0x18] sm:$0xff] %vm553_vm3, %v550_v27 }
 0x13f   : > { %556 = vst.msk [vmem:[#allocation3 + $0x10] sm:$0xff] %vm553_vm3, %v545_v30 }
 0x146   : > { %v576_v31 = vld [vmem:[%s575_s15] sm:$0xff]  ;;  %s1159_s15 = scalar_lea.vmem [#allocation3], %s1577_s27 }
 0x147   : > { %v656_v32 = vadd.f32 %v653_v19, %v576_v31  ;;  %v776_v55 = vld [vmem:[%s775_s29] sm:$0xff] }
 0x148   : > { %v968_v22 = vld [vmem:[%s967_s9] sm:$0xff] }
 0x149   : > { %v1567_v33 = vmul.f32 -1.442695, %v656_v32 }
 0x14b   : > { %1832 = vpow2.f32 %v1567_v33 }
 0x155   : > { %v1833_v34 = vpop.eup %1832 }
 0x156   : > { %v660_v35 = vadd.f32 1.0, %v1833_v34 }
 0x158   : > { %1834 = vrcp.f32 %v660_v35 }
 0x162   : > { %v1835_v36 = vpop.eup %1834 }
 0x163   : > { %v674_v44 = vsub.f32 1.0, %v1835_v36 }
 0x1ac   : > { %v665_v37 = vpop.permute.xlu0 %664 }
 0x1ad   : > { %v667_v38 = vmul.f32 %v1835_v36, %v665_v37 }
 0x1af   : > { %669 = vrot.lane.b32.xlu0 %v667_v38, %s2019_s19 }
 0x1b3   : > { %680 = vrot.lane.b32.xlu0 %v2274_v10, %s2020_s21  ;;  %s1345_s21 = scalar_lea.vmem [#allocation4], %s1577_s27 }
 0x221   : > { %v670_v39 = vpop.permute.xlu0 %669 }
 0x222   : > { %v672_v40 = vadd.f32 %v670_v39, %v576_v31 }
 0x224   : > { %1836 = vtanh.f32 %v672_v40 }
 0x225   : > { %v681_v43 = vpop.permute.xlu0 %680 }
 0x226   : > { %v683_v46 = vmul.f32 %v1835_v36, %v681_v43 }
 0x22e   : > { %v1837_v41 = vpop.eup %1836 }
 0x22f   : > { %676 = vrot.lane.b32.xlu1 %v1837_v41, %s2021_s0 }
 0x2a1   : > { %v677_v45 = vpop.permute.xlu1 %676 }
 0x2a2   : > { %v679_v47 = vmul.f32 %v677_v45, %v674_v44 }
 0x2a4   : > { %v684_v48 = vadd.f32 %v683_v46, %v679_v47 }
 0x2a6   : > { %v771_v49 = vsel %vm691_vm5, %v684_v48, %v681_v43  ;;  %v2338_v50 = vsel %vm691_vm5, %v684_v48, 0.0  ;;  %v1262_v43 = vstv %s1157_s30  ;;  %v561_v48 = vld [vmem:[%s2261_s24] sm:$0xff] }
 0x2a7   : > { %778 = vrot.lane.b32.xlu1 %v771_v49, %s2021_s0  ;;  %vm1263_vm10 = vcmp.lt.s32.totalorder %v1262_v43, %v2319_v23 }
 0x2a8   : > { %v1264_v47 = vsel %vm1263_vm10, 1, %v2017_v14 }
 0x319   : > { %v779_v51 = vpop.permute.xlu1 %778 }
 0x31a   : > { %1650 = vmatmul.mubr.msk.f32.vlgmr.msra.gmra.mrb[4].mxu0 %vm455_vm2, %v779_v51 }
 0x31b   : > { %1705 = vmatpush3.bf16.msra.mxu0 %v2270_v9  ;;  %1663 = vmatprep.mubr.msk.f32.mxu0 %vm2015_vm1, %v2016_v7 }
 0x31c   : > { %1709 = vmatprep.subr.bf16.mxu0 %v2014_v4 }
 0x3ed   : > { %v848_v52 = vpop.f32.mrb[4].mxu0 }
 0x3ee   : > { %v849_v53 = vadd.f32 %v2303_v15, %v848_v52  ;;  %v1651_v54 = vpop.f32.mrb[5].mxu0 }
 0x3f0   : > { %860 = vrot.lane.b32.xlu0 %v849_v53, %s2018_s18  ;;  %v852_v56 = vadd.f32 %v849_v53, %v776_v55 }
 0x3f2   : > { %v1571_v57 = vmul.f32 -1.442695, %v852_v56 }
 0x3f4   : > { %1838 = vpow2.f32 %v1571_v57  ;;  %882 = vperm.xlu0 %1831, %v880_v61  }
 0x3fe   : > { %v1839_v58 = vpop.eup %1838 }
 0x3ff   : > { %v856_v59 = vadd.f32 1.0, %v1839_v58 }
 0x401   : > { %1840 = vrcp.f32 %v856_v59 }
 0x40b   : > { %v1841_v62 = vpop.eup %1840 }
 0x40c   : > { %v870_v5 = vsub.f32 1.0, %v1841_v62  ;;  %v876_v10 = vmul.f32 %v1841_v62, %v771_v49 }
 0x462   : > { %v861_v63 = vpop.permute.xlu0 %860 }
 0x463   : > { %v863_v0 = vmul.f32 %v1841_v62, %v861_v63 }
 0x465   : > { %865 = vrot.lane.b32.xlu1 %v863_v0, %s2019_s19 }
 0x473   : > { %v883_v6 = vpop.permute.xlu0 %882 }
 0x474   : > { %vm884_vm7 = vcmp.eq.s32.totalorder %v883_v6, 1 }
 0x4d7   : > { %v866_v1 = vpop.permute.xlu1 %865 }
 0x4d8   : > { %v868_v2 = vadd.f32 %v866_v1, %v776_v55 }
 0x4da   : > { %1842 = vtanh.f32 %v868_v2 }
 0x4e4   : > { %v1843_v3 = vpop.eup %1842 }
 0x4e5   : > { %872 = vrot.lane.b32.xlu1 %v1843_v3, %s2021_s0 }
 0x557   : > { %v873_v8 = vpop.permute.xlu1 %872 }
 0x558   : > { %v875_v11 = vmul.f32 %v873_v8, %v870_v5 }
 0x55a   : > { %v877_v12 = vadd.f32 %v876_v10, %v875_v11 }
 0x55c   : > { %v2361_v13 = vsel %vm884_vm7, %v877_v12, 0.0  ;;  %v963_v16 = vsel %vm884_vm7, %v877_v12, %v771_v49  ;;  %v562_v49 = vld [vmem:[%s2261_s24 + $0x8] sm:$0xff]  ;;  %s768_s24 = scalar_lea.vmem [#allocation4], %s1564_s20  ;;  %s1583_s20 = sshll.u32 %s1996_s8, 3 }
 0x55d   : > { %970 = vrot.lane.b32.xlu1 %v963_v16, %s2021_s0  ;;  %v1695_v51 = vpack.c.bf16 %v562_v49, %v561_v48  ;;  %s2560_s8 = sand.u32 1, %s1972_s25  }
 0x55f   : > { %1696 = vmatpush3.bf16.msra.mxu1 %v1695_v51 }
 0x560   : > { %1700 = vmatprep.subr.bf16.mxu1 %v2014_v4 }
 0x5cf   : > { %v971_v17 = vpop.permute.xlu1 %970 }
 0x5d0   : > { %1664 = vmatmul.mubr.msk.f32.vlgmr.msra.gmra.mrb[6].mxu0 %vm455_vm2, %v971_v17 }
 0x5d1   : > { %1711 = vmatpush3.bf16.msra.mxu0 %v2270_v9  ;;  %1677 = vmatprep.mubr.msk.f32.mxu0 %vm2015_vm1, %v2016_v7  ;;  %v1072_v9 = vsel %vm1071_vm8, 1, %v2017_v14 }
 0x6a3   : > { %v1040_v19 = vpop.f32.mrb[6].mxu0 }
 0x6a4   : > { %v1041_v20 = vadd.f32 %v2303_v15, %v1040_v19  ;;  %v1665_v21 = vpop.f32.mrb[7].mxu0 }
 0x6a6   : > { %1052 = vrot.lane.b32.xlu0 %v1041_v20, %s2018_s18  ;;  %v1044_v24 = vadd.f32 %v1041_v20, %v968_v22 }
 0x6a8   : > { %v1575_v25 = vmul.f32 -1.442695, %v1044_v24 }
 0x6aa   : > { %1074 = vperm.xlu0 %1831, %v1072_v9   ;;  %1844 = vpow2.f32 %v1575_v25 }
 0x6b4   : > { %v1845_v26 = vpop.eup %1844 }
 0x6b5   : > { %v1048_v27 = vadd.f32 1.0, %v1845_v26 }
 0x6b7   : > { %1846 = vrcp.f32 %v1048_v27 }
 0x6c1   : > { %v1847_v28 = vpop.eup %1846 }
 0x6c2   : > { %v1062_v34 = vsub.f32 1.0, %v1847_v28  ;;  %v1068_v37 = vmul.f32 %v1847_v28, %v963_v16 }
 0x718   : > { %v1053_v29 = vpop.permute.xlu0 %1052 }
 0x719   : > { %v1055_v30 = vmul.f32 %v1847_v28, %v1053_v29 }
 0x71b   : > { %1057 = vrot.lane.b32.xlu1 %v1055_v30, %s2019_s19 }
 0x729   : > { %v1075_v36 = vpop.permute.xlu0 %1074 }
 0x72a   : > { %vm1076_vm9 = vcmp.eq.s32.totalorder %v1075_v36, 1 }
 0x78d   : > { %v1058_v31 = vpop.permute.xlu1 %1057 }
 0x78e   : > { %v1060_v32 = vadd.f32 %v1058_v31, %v968_v22 }
 0x790   : > { %1848 = vtanh.f32 %v1060_v32 }
 0x79a   : > { %v1849_v33 = vpop.eup %1848 }
 0x79b   : > { %1064 = vrot.lane.b32.xlu1 %v1849_v33, %s2021_s0 }
 0x80d   : > { %v1065_v35 = vpop.permute.xlu1 %1064 }
 0x80e   : > { %v1067_v38 = vmul.f32 %v1065_v35, %v1062_v34 }
 0x810   : > { %v1069_v39 = vadd.f32 %v1068_v37, %v1067_v38 }
 0x812   : > { %v1155_v40 = vsel %vm1076_vm9, %v1069_v39, %v963_v16  ;;  %v1077_v41 = vsel %vm1076_vm9, %v1069_v39, 0.0 }
 0x813   : > { %1162 = vrot.lane.b32.xlu0 %v1155_v40, %s2021_s0 }
 0x885   : > { %v1163_v42 = vpop.permute.xlu0 %1162 }
 0x886   : > { %1678 = vmatmul.mubr.msk.f32.vlgmr.msra.gmra.mrb[8].mxu0 %vm455_vm2, %v1163_v42 }
 0x959   : > { %v1232_v44 = vpop.f32.mrb[8].mxu0 }
 0x95a   : > { %v1233_v45 = vadd.f32 %v2303_v15, %v1232_v44  ;;  %v1679_v46 = vpop.f32.mrb[9].mxu0  ;;  %v1160_v15 = vld [vmem:[%s1159_s15] sm:$0xff] }
 0x95c   : > { %1244 = vrot.lane.b32.xlu1 %v1233_v45, %s2018_s18  ;;  %v1236_v23 = vadd.f32 %v1233_v45, %v1160_v15  ;;  %s1153_s18 = scalar_lea.vmem [#allocation4], %s1573_s14  ;;  %s1890_s14 = sshll.u32 %s2022_s10, 4  ;;  %s1891_s14 = int_to_ptr.vmem [resolvable:$false] %s1890_s14 }
 0x95d   : > { %s1892_s9 = scalar_lea.vmem %s1891_s14, 1024  ;;  %p1893_p9 = scmp.lt.s32.totalorder %s2447_s26, %s1891_s14 }
 0x95e   : > { %v1579_v52 = vmul.f32 -1.442695, %v1236_v23  ;;  %p1894_p5 = scmp.lt.s32.totalorder %s1892_s9, %s1886_s16 }
 0x960   : > { %1266 = vperm.xlu1 %1830, %v1264_v47   ;;  %1850 = vpow2.f32 %v1579_v52  ;;  %p1895_p11 = por %p1894_p5, %p1893_p9 }
 0x962   : > { %p1896_p12 = pnand %p1895_p11, %p1889_p6 }
 0x964   : > { %694 = vrot.lane.b32.xlu1 %v2338_v50, %s2021_s0 }
 0x968   : > { %1079 = vrot.lane.b32.xlu1 %v1077_v41, %s2021_s0 }
 0x96a   : > { %v1851_v14 = vpop.eup %1850 }
 0x96b   : > { %v1240_v53 = vadd.f32 1.0, %v1851_v14 }
 0x96d   : > { %1852 = vrcp.f32 %v1240_v53 }
 0x977   : > { %v1853_v54 = vpop.eup %1852 }
 0x978   : > { %v1254_v63 = vsub.f32 1.0, %v1853_v54  ;;  %v1260_v1 = vmul.f32 %v1853_v54, %v1155_v40 }
 0x9ce   : > { %v1245_v55 = vpop.permute.xlu1 %1244 }
 0x9cf   : > { %v1247_v56 = vmul.f32 %v1853_v54, %v1245_v55 }
 0x9d1   : > { %1249 = vrot.lane.b32.xlu0 %v1247_v56, %s2019_s19  ;;  %s1379_s19 = sadd.s32 %s1583_s20, %s2321_s23  ;;  %s2455_s23 = scalar_lea.sflag [#allocation7], %s2560_s8 }
 0x9df   : > { %v1267_v57 = vpop.permute.xlu1 %1266 }
 0x9e0   : > { %vm1268_vm12 = vcmp.eq.s32.totalorder %v1267_v57, 1 }
 0x9e3   : > { %v695_v50 = vpop.permute.xlu1 %694 }
 0x9e4   : > { %1643 = vmatmul.mubr.msk.f32.vlgmr.msra.gmra.mrb[2].mxu1 %vm455_vm2, %v695_v50 }
 0x9e5   : > { %1702 = vmatpush3.bf16.msra.mxu1 %v1695_v51  ;;  %1656 = vmatprep.mubr.msk.f32.mxu1 %vm2015_vm1, %v2016_v7 }
 0x9e6   : > { %1706 = vmatprep.subr.bf16.mxu1 %v2014_v4 }
 0x9e7   : > { %v1080_v10 = vpop.permute.xlu1 %1079 }
 0xa43   : > { %v1250_v58 = vpop.permute.xlu0 %1249 }
 0xa44   : > { %v1252_v59 = vadd.f32 %v1250_v58, %v1160_v15 }
 0xa46   : > { %1854 = vtanh.f32 %v1252_v59 }
 0xa50   : > { %v1855_v60 = vpop.eup %1854 }
 0xa51   : > { %1256 = vrot.lane.b32.xlu0 %v1855_v60, %s2021_s0 }
 0xa55   : > { %887 = vrot.lane.b32.xlu0 %v2361_v13, %s2021_s0 }
 0xab7   : > { %v764_v61 = vpop.f32.mrb[2].mxu1 }
 0xab8   : > { %770 = vst.msk [vmem:[%s768_s24] sm:$0xff] %vm769_vm11, %v764_v61  ;;  %v1644_v62 = vpop.f32.mrb[3].mxu1 }
 0xac3   : > { %v1257_v0 = vpop.permute.xlu0 %1256 }
 0xac4   : > { %v1259_v2 = vmul.f32 %v1257_v0, %v1254_v63 }
 0xac6   : > { %v1261_v3 = vadd.f32 %v1260_v1, %v1259_v2 }
 0xac7   : > { %v888_v5 = vpop.permute.xlu0 %887 }
 0xac8   : > { %1657 = vmatmul.mubr.msk.f32.vlgmr.msra.gmra.mrb[4].mxu1 %vm455_vm2, %v888_v5  ;;  %v1269_v6 = vsel %vm1268_vm12, %v1261_v3, 0.0  ;;  %v1347_v8 = vsel %vm1268_vm12, %v1261_v3, %v1155_v40 }
 0xac9   : > { %1271 = vrot.lane.b32.xlu0 %v1269_v6, %s2021_s0  ;;  %1349 = vrot.lane.b32.xlu1 %v1347_v8, %s2021_s0  ;;  %s1584_s0 = sshll.u32 %s1379_s19, 7 }
 0xaca   : > { %1708 = vmatpush3.bf16.msra.mxu1 %v1695_v51  ;;  %1670 = vmatprep.mubr.msk.f32.mxu1 %vm2015_vm1, %v2016_v7  ;;  %s2445_s17 = scalar_lea.hbm %s2523_s7, %s1584_s0 }
 0xacb   : > { %1712 = vmatprep.subr.bf16.mxu1 %v2014_v4 }
 0xacd   : > { %1671 = vmatmul.mubr.msk.f32.vlgmr.msra.gmra.mrb[6].mxu1 %vm455_vm2, %v1080_v10 }
 0xace   : > { %1714 = vmatpush3.bf16.msra.mxu1 %v1695_v51  ;;  %1684 = vmatprep.mubr.msk.f32.mxu1 %vm2015_vm1, %v2016_v7 }
 0xb3b   : > { %v1272_v11 = vpop.permute.xlu0 %1271  ;;  %v1350_v12 = vpop.permute.xlu1 %1349 }
 0xb3c   : > { %1352 = vst.msk [vmem:[#allocation2] sm:$0xff] %vm455_vm2, %v1350_v12  ;;  %1685 = vmatmul.mubr.msk.f32.vlgmr.msra.gmra.mrb[8].mxu1 %vm455_vm2, %v1272_v11 }
 0xb9b   : > { %v957_v13 = vpop.f32.mrb[4].mxu1 }
 0xb9c   : > { %962 = vst.msk [vmem:[%s961_s22] sm:$0xff] %vm769_vm11, %v957_v13  ;;  %v1658_v4 = vpop.f32.mrb[5].mxu1 }
 0xba0   : > { %v1149_v16 = vpop.f32.mrb[6].mxu1 }
 0xba1   : > { %1154 = vst.msk [vmem:[%s1153_s18] sm:$0xff] %vm769_vm11, %v1149_v16  ;;  %v1672_v7 = vpop.f32.mrb[7].mxu1 }
 0xba8   : > { %v1354_v17 = vld [vmem:[#allocation4 + $0x8] sm:$0xff]  ;;  %v1355_v18 = vld [vmem:[#allocation4 + $0x10] sm:$0xff] }
 0xba9   : > { %1358 = vst.msk [vmem:[%s2263_s11 + $0x8] sm:$0xff] %vm769_vm11, %v1354_v17  ;;  %1359 = vst.msk [vmem:[%s2263_s11 + $0x10] sm:$0xff] %vm769_vm11, %v1355_v18 }
 0xc0f   : > { %v1341_v19 = vpop.f32.mrb[8].mxu1 }
 0xc10   : > { %1346 = vst.msk [vmem:[%s1345_s21] sm:$0xff] %vm769_vm11, %v1341_v19  ;;  %v1686_v20 = vpop.f32.mrb[9].mxu1 }
 0xc17   : > { %v1353_v21 = vld [vmem:[#allocation4] sm:$0xff]  ;;  %v1356_v9 = vld [vmem:[#allocation4 + $0x18] sm:$0xff] }
 0xc18   : > { %1357 = vst.msk [vmem:[%s2263_s11] sm:$0xff] %vm769_vm11, %v1353_v21  ;;  %1360 = vst.msk [vmem:[%s2263_s11 + $0x18] sm:$0xff] %vm769_vm11, %v1356_v9 }
 0xc19   : > { %1899 = shalt.err (!%p1896_p12)
}
 0xc1a   : > { %s1900_s11 = scalar_lea.hbm %s2445_s17, 512  ;;  %s1904_s27 = scalar_lea.hbm %s2523_s7, 2048 }
 0xc1b   : > { %p1901_p4 = scmp.ne.s32.totalorder %s2445_s17, %s1900_s11  ;;  %p1905_p0 = scmp.lt.u32.totalorder %s2445_s17, %s2523_s7 }
 0xc1c   : > { %p1906_p7 = scmp.lt.u32.totalorder %s1904_s27, %s1900_s11  ;;  %p1908_p3 = scmp.lt.u32.totalorder %s1900_s11, %s2445_s17 }
 0xc1d   : > { %p1902_p8 = pnand %p1901_p4, %p2561_p13 }
 0xc1e   : > { %p1907_p2 = por %p1906_p7, %p1905_p0 }
 0xc1f   : > { %p1903_p10 = pneg %p1902_p8 }
 0xc20   : > { %p1909_p1 = por %p1908_p3, %p1907_p2 }
 0xc22   : > { %p1910_p6 = pnand %p1909_p1, %p1903_p10 }
 0xc24   : > { %1913 = shalt.err (!%p1910_p6)
}
 0xc25   : > { %s2023_s22 = smov 128   ;;  %s2024_s18 = smov 8  }
 0xc26   : > { %1717 = dma.vmem_to_hbm [thread:$0]  (%p2561_p13), %s2447_s26, 512, %s2445_s17, %s2455_s23, %s2023_s22, %s2023_s22, %s2024_s18  }
 0xc27 PF: > { %s2562_s20 = sld [smem:[#allocation17_spill]]  ;;  %s2563_s19 = sld [smem:[#allocation11_spill]] }
 0xc28   : > { %s2564_s21 = sld [smem:[#allocation22_spill]] }
 0xc2d   : > { %p1728_p9 = scmp.ge.s32.totalorder %s2562_s20, 2  ;;  %s1397_s0 = sand.u32 1, %s2563_s19  }
 0xc2e   : > { %p2565_p5 = scmp.ne.s32.totalorder %s2564_s21, 0  ;;  %s1398_s28 = scalar_lea.sflag [#allocation7], %s1397_s0 }
 0xc30   : > { %p1724_p11 = pnand %p1728_p9, %p2565_p5 }
 0xc32   : > { %1963 = dma.done.wait (!%p1724_p11), %s1398_s28, 512  }
 0xc33   : > { %1965 = vsyncadd (!%p1724_p11), %s1398_s28, 4294966784  ;;  %s23_s11 = sadd.s32 1, %s2562_s20   ;;  %s2566_s29 = sld [smem:[#allocation12_spill]] }
 0xc34   : > { %p20_p12 = scmp.ge.s32.totalorder %s23_s11, 6   ;;  %s2567_s26 = sld [smem:[#allocation21_spill]] }
 0xc35   : > { %s2568_s27 = sld [smem:[#allocation13_spill]]  ;;  %s2569_s28 = sld [smem:[#allocation14_spill]] }
 0xc36   : > { %s2570_s13 = sld [smem:[#allocation20_spill]]  ;;  %s2571_s30 = sld [smem:[#allocation15_spill]] }
 0xc37   : > { %s2572_s8 = sld [smem:[#allocation16_spill]]  ;;  %s2573_s9 = sld [smem:[#allocation18_spill]] }
 0xc38   : > { %s2574_s10 = sld [smem:[#allocation19_spill]]  ;;  %s2575_s24 = smov %s1972_s25 }
 0xc39   : > { %s2576_s25 = smov %s2566_s29  ;;  %22 = sbr.rel (!%p20_p12) target bundleno = 11 (0xb), region = 120 }
 0xc3c   : > { %s2577_s29 = smov %s2570_s13 }
 0xc40   :  { %1403 = vsyncpa [#allocation6], 1 }
 0xc41   :  { %1405 = vsyncpa [#allocation6 + $0x1], 1 }
 0xc42   :  { %1406 = vsyncpa [#allocation7], 1 }
 0xc43   :  { %1408 = vsyncpa [#allocation7 + $0x1], 1 }

</bundles_post_ra>
